<compile_context>
chip_gen: v7x
topology: tpu7x:2x2x1
jax: 0.10.0
libtpu: 0.0.40
codegen_flags: <defaults>
</compile_context>

<pallas_src>
import functools

import jax
import jax.numpy as jnp
from jax import lax
from jax.experimental import pallas as pl
from jax.experimental.pallas import tpu as pltpu

K_CNN = (2, 3, 4, 5, 6)
BN_EPS = 1e-5


# ----------------------------------------------------------------- kernel
def _fused_cnn_kernel(xi_ref, w_ref, aux_ref, out_ref, *,
                      batch, seq_len, k_cnn, d_h):
    nk = len(k_cnn)
    nf = 4 * d_h                 # concat of the 4 streams' features (128 lanes for d_h=32)
    ncol = nk * nf               # wide-matmul output columns: [kernel j][stream s][d_h]

    xi = xi_ref[...]             # (B*L, kmax*c_pad) zero-padded im2col (host built)
    w = w_ref[...]               # (kmax*c_pad, ncol) packed conv weights (BN folded in)
    aux = aux_ref[...]           # (2, ncol): row0 = cshift, row1 = [fc_w | fc_b bcast]

    # One wide MXU matmul replaces the 4 * nk * sum(h) per-tap matmuls.
    y = jnp.dot(xi, w, preferred_element_type=jnp.float32)          # (B*L, ncol)
    # folded conv-bias + eval-BatchNorm shift, then ReLU
    y = jnp.maximum(y + aux[0:1, :ncol], 0.0)
    y = y.reshape(batch, seq_len, ncol)                             # sublane unfold

    # Masked global max-pool over positions (per j-block valid length L-h+1), then a
    # running max over kernel sizes.  ReLU output >= 0, so zero-masking is exact.
    pos = lax.broadcasted_iota(jnp.int32, (batch, seq_len, nf), 1)  # hoisted once
    feats = None
    for j, h in enumerate(k_cnn):
        blk = y[:, :, j * nf:(j + 1) * nf]                          # 128-lane aligned slice
        blk = jnp.where(pos < (seq_len - h + 1), blk, 0.0)
        pooled = jnp.max(blk, axis=1)                               # (B, nf)
        feats = pooled if feats is None else jnp.maximum(feats, pooled)

    # Final Linear (d_output == 1) as VPU multiply + lane reduction, then sigmoid.
    fcw = aux[1:2, :nf]                                             # (1, nf)
    fcb = jnp.max(aux[1:2, nf:2 * nf], axis=1, keepdims=True)       # (1, 1): lanes all = fc_b
    logits = jnp.sum(feats * fcw, axis=1, keepdims=True) + fcb      # (B, 1)
    out_ref[...] = 1.0 / (1.0 + jnp.exp(-logits))


# ----------------------------------------------------------------- wrapper
def multi_cnn_forward(AAI, onehot, BLOSUM62, PAAC, esm, params, *,
                      d_h, d_output=1, k_cnn=K_CNN):
    del esm  # esm_feat is accepted but unused by the torch module's forward()
    assert d_output == 1, "fused kernel implements the module default d_output=1"
    B, L, _ = AAI.shape
    xs = [AAI, onehot, BLOSUM62, PAAC]
    d_in = [int(x.shape[-1]) for x in xs]
    nk = len(k_cnn)
    kmax = max(k_cnn)
    nf = 4 * d_h
    ncol = nk * nf

    # ---- input slab: concat the 4 streams' channels, pad to a lane multiple, then a
    #      zero-padded im2col of kmax row-shifted copies (built per sequence, so conv
    #      windows never cross batch elements; invalid positions are masked in-kernel).
    x_cat = jnp.concatenate([x.astype(jnp.float32) for x in xs], axis=-1)   # (B, L, Ct)
    c_tot = x_cat.shape[-1]
    c_pad = ((c_tot + 127) // 128) * 128
    x_cat = jnp.pad(x_cat, ((0, 0), (0, 0), (0, c_pad - c_tot)))
    taps = [jnp.pad(x_cat[:, dt:, :], ((0, 0), (0, dt), (0, 0))) for dt in range(kmax)]
    xi = jnp.concatenate(taps, axis=-1).reshape(B * L, kmax * c_pad)        # (B*L, 768)

    # ---- packed conv weights (kmax*c_pad, nk*4*d_h), columns ordered [j][s][d_h].
    #      PAAC eval-BN scale and each conv's eval-BN scale are folded into the
    #      weights; conv bias + BN shift (+ PAAC-BN shift contribution) fold into
    #      one per-column shift row.  Exactly equivalent for eval-mode BN.
    offs, o = [], 0
    for c in d_in:
        offs.append(o)
        o += c
    s4 = params["bn4_g"] / jnp.sqrt(params["bn4_v"] + BN_EPS)
    t4 = params["bn4_b"] - params["bn4_m"] * s4

    j_blocks, shift_parts = [], []
    for j, h in enumerate(k_cnn):
        s_blocks = []
        for s in range(4):
            w = params["conv_w"][s][j].astype(jnp.float32)     # (d_h, C_s, h) torch layout
            b = params["conv_b"][s][j].astype(jnp.float32)
            if s == 3:                                         # fold PAAC BatchNorm1d
                b = b + jnp.einsum("oih,i->o", w, t4)
                w = w * s4[None, :, None]
            sc = params["bn_g"][s][j] / jnp.sqrt(params["bn_v"][s][j] + BN_EPS)
            shift_parts.append(params["bn_b"][s][j] + (b - params["bn_m"][s][j]) * sc)
            wt = jnp.transpose(w * sc[:, None, None], (2, 1, 0))          # (h, C_s, d_h)
            wt = jnp.pad(wt, ((0, kmax - h),
                              (offs[s], c_pad - offs[s] - d_in[s]),
                              (0, 0)))                                    # (kmax, c_pad, d_h)
            s_blocks.append(wt.reshape(kmax * c_pad, d_h))
        j_blocks.append(jnp.concatenate(s_blocks, axis=1))                # (kmax*c_pad, nf)
    w_packed = jnp.concatenate(j_blocks, axis=1).astype(jnp.float32)      # (768, 640)

    # ---- aux slab: row 0 = cshift (ncol lanes); row 1 = [fc_w (nf) | fc_b bcast (nf)]
    auxw = max(ncol, 2 * nf)
    aux = jnp.zeros((2, auxw), jnp.float32)
    aux = aux.at[0, :ncol].set(jnp.concatenate(shift_parts).astype(jnp.float32))
    aux = aux.at[1, :nf].set(params["fc_w"][0].astype(jnp.float32))
    aux = aux.at[1, nf:2 * nf].set(params["fc_b"][0].astype(jnp.float32))

    kern = functools.partial(_fused_cnn_kernel, batch=B, seq_len=L,
                             k_cnn=tuple(k_cnn), d_h=d_h)

    # Single fused, gridless invocation: 3 operand DMAs, everything resident in VMEM.
    # TODO(synk): when B*L scales up, add a batch-tile grid (rows a multiple of L) with
    # dimension_semantics=("parallel",) so both v7x TensorCores are used, sized for
    # v7x's 64 MiB VMEM.
    vmem = pl.BlockSpec(memory_space=pltpu.MemorySpace.VMEM)
    return pl.pallas_call(
        kern,
        out_shape=jax.ShapeDtypeStruct((B, d_output), jnp.float32),
        in_specs=[vmem, vmem, vmem],
        out_specs=vmem,
        compiler_params=pltpu.CompilerParams(vmem_limit_bytes=32 * 1024 * 1024),
    )(xi, w_packed, aux)


# ------------------------------------------------------- pure-JAX reference
def reference_forward(AAI, onehot, BLOSUM62, PAAC, esm, params, *, k_cnn=K_CNN):
    del esm

    def bn_eval(x_ncl, g, b, m, v):
        s = g / jnp.sqrt(v + BN_EPS)
        return x_ncl * s[None, :, None] + (b - m * s)[None, :, None]

    def stream(x_ncl, s_idx):
        outs = []
        for j, h in enumerate(k_cnn):
            y = lax.conv_general_dilated(
                x_ncl, params["conv_w"][s_idx][j], (1,), "VALID",
                dimension_numbers=("NCH", "OIH", "NCH"))
            y = y + params["conv_b"][s_idx][j][None, :, None]
            y = bn_eval(y, params["bn_g"][s_idx][j], params["bn_b"][s_idx][j],
                        params["bn_m"][s_idx][j], params["bn_v"][s_idx][j])
            y = jnp.maximum(y, 0.0)
            outs.append(jnp.max(y, axis=2, keepdims=True))       # MaxPool1d(L-h+1)
        cat = jnp.concatenate(outs, axis=2)                      # (B, d_h, nk)
        return jnp.max(cat, axis=2)                              # MaxPool1d(nk)

    x1 = jnp.transpose(AAI, (0, 2, 1))
    x2 = jnp.transpose(onehot, (0, 2, 1))
    x3 = jnp.transpose(BLOSUM62, (0, 2, 1))
    x4 = bn_eval(jnp.transpose(PAAC, (0, 2, 1)),
                 params["bn4_g"], params["bn4_b"], params["bn4_m"], params["bn4_v"])
    feats = jnp.concatenate(
        [stream(x1, 0), stream(x2, 1), stream(x3, 2), stream(x4, 3)], axis=1)
    logits = feats @ params["fc_w"].T + params["fc_b"]
    return jax.nn.sigmoid(logits)


# ----------------------------------------------------------------- params
def init_params(key, d_input, d_h, k_cnn, d_output):
    keys = iter(jax.random.split(key, 512))

    def nrm(shape, scale=0.1):
        return (scale * jax.random.normal(next(keys), shape)).astype(jnp.float32)

    def per_stream(fn):
        return [[fn(s, h) for h in k_cnn] for s in range(4)]

    return dict(
        conv_w=per_stream(lambda s, h: nrm((d_h, d_input[s], h))),
        conv_b=per_stream(lambda s, h: nrm((d_h,))),
        bn_g=per_stream(lambda s, h: 1.0 + nrm((d_h,))),
        bn_b=per_stream(lambda s, h: nrm((d_h,))),
        bn_m=per_stream(lambda s, h: nrm((d_h,))),
        bn_v=per_stream(lambda s, h: 0.5 + jax.random.uniform(next(keys), (d_h,))),
        bn4_g=1.0 + nrm((d_input[3],)),
        bn4_b=nrm((d_input[3],)),
        bn4_m=nrm((d_input[3],)),
        bn4_v=0.5 + jax.random.uniform(next(keys), (d_input[3],)),
        fc_w=nrm((d_output, 4 * d_h)),
        fc_b=nrm((d_output,)),
    )


if __name__ == "__main__":
    B, L = 2, 16                       # small seq_len (>= max kernel size 6)
    d_input = (40, 21, 23, 3)          # AAI / onehot / BLOSUM62 / PAAC channels
    d_h = 32                           # d_another_h
    d_output = 1

    key = jax.random.PRNGKey(0)
    k_in, k_par = jax.random.split(key)
    kis = jax.random.split(k_in, 5)
    AAI      = jax.random.normal(kis[0], (B, L, d_input[0]), jnp.float32)
    onehot   = jax.random.normal(kis[1], (B, L, d_input[1]), jnp.float32)
    BLOSUM62 = jax.random.normal(kis[2], (B, L, d_input[2]), jnp.float32)
    PAAC     = jax.random.normal(kis[3], (B, L, d_input[3]), jnp.float32)
    esm      = jax.random.normal(kis[4], (B, L, 8), jnp.float32)   # unused by forward

    params = init_params(k_par, d_input, d_h, K_CNN, d_output)

    fwd = jax.jit(functools.partial(multi_cnn_forward, d_h=d_h, d_output=d_output))
    out = jax.block_until_ready(fwd(AAI, onehot, BLOSUM62, PAAC, esm, params))

    ref = reference_forward(AAI, onehot, BLOSUM62, PAAC, esm, params)
    assert out.shape == (B, d_output)
    err = float(jnp.max(jnp.abs(out - ref)))
    assert err < 1e-3, f"max abs err {err}"
    print("KERNEL_OK")
</pallas_src>

<mosaic_0001>
module attributes {stable_mosaic.version = 11 : i64} {
  func.func @_fused_cnn_kernel(%arg0: memref<32x768xf32, #tpu.memory_space<vmem>>, %arg1: memref<768x640xf32, #tpu.memory_space<vmem>>, %arg2: memref<2x640xf32, #tpu.memory_space<vmem>>, %arg3: memref<2x1xf32, #tpu.memory_space<vmem>>) attributes {dimension_semantics = [], scalar_prefetch = 0 : i64, scratch_operands = 0 : i64, tpu.core_type = #tpu.core_type<tc>} {
    %c0 = arith.constant 0 : index
    %c0_0 = arith.constant 0 : index
    %0 = vector.load %arg0[%c0, %c0_0] : memref<32x768xf32, #tpu.memory_space<vmem>>, vector<32x768xf32>
    %c0_1 = arith.constant 0 : index
    %c0_2 = arith.constant 0 : index
    %1 = vector.load %arg1[%c0_1, %c0_2] : memref<768x640xf32, #tpu.memory_space<vmem>>, vector<768x640xf32>
    %c0_3 = arith.constant 0 : index
    %c0_4 = arith.constant 0 : index
    %2 = vector.load %arg2[%c0_3, %c0_4] : memref<2x640xf32, #tpu.memory_space<vmem>>, vector<2x640xf32>
    %cst = arith.constant dense<0.000000e+00> : vector<32x640xf32>
    %3 = tpu.matmul %0, %1, %cst {dimension_numbers = #tpu.dot_dimension_numbers<[1], [0], [0], [1], [0, 0, 1, 1], [], []>} : vector<32x768xf32>, vector<768x640xf32>, vector<32x640xf32> -> vector<32x640xf32>
    %4 = vector.extract_strided_slice %2 {offsets = [0, 0], sizes = [1, 640], strides = [1, 1]} : vector<2x640xf32> to vector<1x640xf32>
    %5 = vector.broadcast %4 : vector<1x640xf32> to vector<32x640xf32>
    %6 = arith.addf %3, %5 : vector<32x640xf32>
    %cst_5 = arith.constant 0.000000e+00 : f32
    %7 = vector.broadcast %cst_5 : f32 to vector<32x640xf32>
    %8 = arith.maximumf %6, %7 : vector<32x640xf32>
    %9 = vector.shape_cast %8 : vector<32x640xf32> to vector<2x16x640xf32>
    %10 = tpu.iota {dimensions = array<i32: 1>} : vector<2x16x128xi32>
    %11 = vector.extract_strided_slice %9 {offsets = [0, 0, 0], sizes = [2, 16, 128], strides = [1, 1, 1]} : vector<2x16x640xf32> to vector<2x16x128xf32>
    %c15_i32 = arith.constant 15 : i32
    %12 = vector.broadcast %c15_i32 : i32 to vector<2x16x128xi32>
    %13 = arith.cmpi slt, %10, %12 : vector<2x16x128xi32>
    %cst_6 = arith.constant 0.000000e+00 : f32
    %14 = vector.broadcast %cst_6 : f32 to vector<2x16x128xf32>
    %15 = arith.select %13, %11, %14 : vector<2x16x128xi1>, vector<2x16x128xf32>
    %cst_7 = arith.constant dense<0xFF800000> : vector<2x128xf32>
    %16 = vector.multi_reduction <maximumf>, %15, %cst_7 [1] : vector<2x16x128xf32> to vector<2x128xf32>
    %17 = vector.extract_strided_slice %9 {offsets = [0, 0, 128], sizes = [2, 16, 128], strides = [1, 1, 1]} : vector<2x16x640xf32> to vector<2x16x128xf32>
    %c14_i32 = arith.constant 14 : i32
    %18 = vector.broadcast %c14_i32 : i32 to vector<2x16x128xi32>
    %19 = arith.cmpi slt, %10, %18 : vector<2x16x128xi32>
    %cst_8 = arith.constant 0.000000e+00 : f32
    %20 = vector.broadcast %cst_8 : f32 to vector<2x16x128xf32>
    %21 = arith.select %19, %17, %20 : vector<2x16x128xi1>, vector<2x16x128xf32>
    %cst_9 = arith.constant dense<0xFF800000> : vector<2x128xf32>
    %22 = vector.multi_reduction <maximumf>, %21, %cst_9 [1] : vector<2x16x128xf32> to vector<2x128xf32>
    %23 = arith.maximumf %16, %22 : vector<2x128xf32>
    %24 = vector.extract_strided_slice %9 {offsets = [0, 0, 256], sizes = [2, 16, 128], strides = [1, 1, 1]} : vector<2x16x640xf32> to vector<2x16x128xf32>
    %c13_i32 = arith.constant 13 : i32
    %25 = vector.broadcast %c13_i32 : i32 to vector<2x16x128xi32>
    %26 = arith.cmpi slt, %10, %25 : vector<2x16x128xi32>
    %cst_10 = arith.constant 0.000000e+00 : f32
    %27 = vector.broadcast %cst_10 : f32 to vector<2x16x128xf32>
    %28 = arith.select %26, %24, %27 : vector<2x16x128xi1>, vector<2x16x128xf32>
    %cst_11 = arith.constant dense<0xFF800000> : vector<2x128xf32>
    %29 = vector.multi_reduction <maximumf>, %28, %cst_11 [1] : vector<2x16x128xf32> to vector<2x128xf32>
    %30 = arith.maximumf %23, %29 : vector<2x128xf32>
    %31 = vector.extract_strided_slice %9 {offsets = [0, 0, 384], sizes = [2, 16, 128], strides = [1, 1, 1]} : vector<2x16x640xf32> to vector<2x16x128xf32>
    %c12_i32 = arith.constant 12 : i32
    %32 = vector.broadcast %c12_i32 : i32 to vector<2x16x128xi32>
    %33 = arith.cmpi slt, %10, %32 : vector<2x16x128xi32>
    %cst_12 = arith.constant 0.000000e+00 : f32
    %34 = vector.broadcast %cst_12 : f32 to vector<2x16x128xf32>
    %35 = arith.select %33, %31, %34 : vector<2x16x128xi1>, vector<2x16x128xf32>
    %cst_13 = arith.constant dense<0xFF800000> : vector<2x128xf32>
    %36 = vector.multi_reduction <maximumf>, %35, %cst_13 [1] : vector<2x16x128xf32> to vector<2x128xf32>
    %37 = arith.maximumf %30, %36 : vector<2x128xf32>
    %38 = vector.extract_strided_slice %9 {offsets = [0, 0, 512], sizes = [2, 16, 128], strides = [1, 1, 1]} : vector<2x16x640xf32> to vector<2x16x128xf32>
    %c11_i32 = arith.constant 11 : i32
    %39 = vector.broadcast %c11_i32 : i32 to vector<2x16x128xi32>
    %40 = arith.cmpi slt, %10, %39 : vector<2x16x128xi32>
    %cst_14 = arith.constant 0.000000e+00 : f32
    %41 = vector.broadcast %cst_14 : f32 to vector<2x16x128xf32>
    %42 = arith.select %40, %38, %41 : vector<2x16x128xi1>, vector<2x16x128xf32>
    %cst_15 = arith.constant dense<0xFF800000> : vector<2x128xf32>
    %43 = vector.multi_reduction <maximumf>, %42, %cst_15 [1] : vector<2x16x128xf32> to vector<2x128xf32>
    %44 = arith.maximumf %37, %43 : vector<2x128xf32>
    %45 = vector.extract_strided_slice %2 {offsets = [1, 0], sizes = [1, 128], strides = [1, 1]} : vector<2x640xf32> to vector<1x128xf32>
    %46 = vector.extract_strided_slice %2 {offsets = [1, 128], sizes = [1, 128], strides = [1, 1]} : vector<2x640xf32> to vector<1x128xf32>
    %cst_16 = arith.constant dense<0xFF800000> : vector<1xf32>
    %47 = vector.multi_reduction <maximumf>, %46, %cst_16 [1] : vector<1x128xf32> to vector<1xf32>
    %48 = vector.shape_cast %47 : vector<1xf32> to vector<1x1xf32>
    %49 = vector.broadcast %45 : vector<1x128xf32> to vector<2x128xf32>
    %50 = arith.mulf %44, %49 : vector<2x128xf32>
    %cst_17 = arith.constant dense<0.000000e+00> : vector<2xf32>
    %51 = vector.multi_reduction <add>, %50, %cst_17 [1] : vector<2x128xf32> to vector<2xf32>
    %52 = vector.shape_cast %51 : vector<2xf32> to vector<2x1xf32>
    %53 = vector.broadcast %48 : vector<1x1xf32> to vector<2x1xf32>
    %54 = arith.addf %52, %53 : vector<2x1xf32>
    %cst_18 = arith.constant 0.000000e+00 : f32
    %55 = vector.broadcast %cst_18 : f32 to vector<2x1xf32>
    %56 = arith.subf %55, %54 : vector<2x1xf32>
    %57 = math.exp %56 : vector<2x1xf32>
    %cst_19 = arith.constant 1.000000e+00 : f32
    %58 = vector.broadcast %cst_19 : f32 to vector<2x1xf32>
    %59 = arith.addf %58, %57 : vector<2x1xf32>
    %cst_20 = arith.constant 1.000000e+00 : f32
    %60 = vector.broadcast %cst_20 : f32 to vector<2x1xf32>
    %61 = arith.divf %60, %59 : vector<2x1xf32>
    %c0_21 = arith.constant 0 : index
    %c0_22 = arith.constant 0 : index
    %62 = vector.load %arg3[%c0_21, %c0_22] : memref<2x1xf32, #tpu.memory_space<vmem>>, vector<2x1xf32>
    tpu.vector_store %arg3[%c0_21, %c0_22], %61 {strides = array<i32>} : memref<2x1xf32, #tpu.memory_space<vmem>>, vector<2x1xf32>,
    return
  }
}

</mosaic_0001>

<bundles_post_ra>
// kernel: multi_cnn_forward.1
= control target key start
LH: loop header
LB: loop body
LE: loop exit
PB: predicated region body
PF: predicated region fallthrough
CT: control target
= control target key end

     0   :  { %vm1492_vm0 = vcmask 1041409   ;;  %vm1507_vm6 = vcmask 1041408   ;;  %vm1522_vm7 = vcmask 1024   ;;  %s3935_s1 = inlined_call_operand.vmem [shape: f32[768,640], index: 1, kind: input, shape index: {}]   ;;  %s3936_s0 = inlined_call_operand.vmem [shape: f32[32,768], index: 0, kind: input, shape index: {}]   ;;  %s3937_s2 = inlined_call_operand.vmem [shape: f32[2,640], index: 2, kind: input, shape index: {}]   ;;  %s3938_s3 = inlined_call_operand.vmem [shape: f32[2,1], index: 3, kind: output, shape index: {}]  }
   0x1   :  { %v39_v0 = vld [vmem:[%s3935_s1 + $0x8] sm:$0xff]  ;;  %v44_v1 = vld [vmem:[%s3935_s1 + $0x30] sm:$0xff]  ;;  %v41_v2 = vld [vmem:[%s3935_s1 + $0x18] sm:$0xff] }
   0x2   :  { %v1660_v3 = vpack.c.bf16 %v44_v1, %v39_v0  ;;  %v46_v4 = vld [vmem:[%s3935_s1 + $0x40] sm:$0xff]  ;;  %v43_v6 = vld [vmem:[%s3935_s1 + $0x28] sm:$0xff]  ;;  %v40_v9 = vld [vmem:[%s3935_s1 + $0x10] sm:$0xff] }
   0x3   :  { %v38_v5 = vld [vmem:[%s3935_s1] sm:$0xff]  ;;  %v1852_v7 = vpack.c.bf16 %v46_v4, %v41_v2  ;;  %v45_v10 = vld [vmem:[%s3935_s1 + $0x38] sm:$0xff]  ;;  %v51_v14 = vld [vmem:[%s3935_s1 + $0x68] sm:$0xff] }
   0x4   :  { %v1662_v8 = vpack.c.bf16 %v43_v6, %v38_v5  ;;  %v49_v11 = vld [vmem:[%s3935_s1 + $0x58] sm:$0xff]  ;;  %1661 = vmatprep.subr.bf16.mxu0 %v1660_v3  ;;  %v1854_v12 = vpack.c.bf16 %v45_v10, %v40_v9  ;;  %v54_v13 = vld [vmem:[%s3935_s1 + $0x80] sm:$0xff]  ;;  %v56_v15 = vld [vmem:[%s3935_s1 + $0x90] sm:$0xff] }
   0x5   :  { %1853 = vmatprep.subr.bf16.mxu1 %v1852_v7  ;;  %v1664_v16 = vpack.c.bf16 %v54_v13, %v49_v11  ;;  %v1856_v17 = vpack.c.bf16 %v56_v15, %v51_v14  ;;  %v48_v18 = vld [vmem:[%s3935_s1 + $0x50] sm:$0xff]  ;;  %v53_v19 = vld [vmem:[%s3935_s1 + $0x78] sm:$0xff]  ;;  %v50_v20 = vld [vmem:[%s3935_s1 + $0x60] sm:$0xff] }
   0x6   :  { %1663 = vmatpush1.bf16.msra.mxu0 %v1662_v8  ;;  %1855 = vmatpush1.bf16.msra.mxu1 %v1854_v12  ;;  %v1666_v21 = vpack.c.bf16 %v53_v19, %v48_v18  ;;  %v55_v22 = vld [vmem:[%s3935_s1 + $0x88] sm:$0xff]  ;;  %v64_v24 = vld [vmem:[%s3935_s1 + $0xd0] sm:$0xff]  ;;  %v61_v27 = vld [vmem:[%s3935_s1 + $0xb8] sm:$0xff] }
   0x7   :  { %v59_v23 = vld [vmem:[%s3935_s1 + $0xa8] sm:$0xff]  ;;  %1665 = vmatprep.subr.bf16.mxu0 %v1664_v16  ;;  %1857 = vmatprep.subr.bf16.mxu1 %v1856_v17  ;;  %v1858_v25 = vpack.c.bf16 %v55_v22, %v50_v20  ;;  %v66_v28 = vld [vmem:[%s3935_s1 + $0xe0] sm:$0xff]  ;;  %v60_v32 = vld [vmem:[%s3935_s1 + $0xb0] sm:$0xff] }
   0x8   :  { %v1668_v26 = vpack.c.bf16 %v64_v24, %v59_v23  ;;  %v58_v29 = vld [vmem:[%s3935_s1 + $0xa0] sm:$0xff]  ;;  %v1860_v30 = vpack.c.bf16 %v66_v28, %v61_v27  ;;  %v63_v31 = vld [vmem:[%s3935_s1 + $0xc8] sm:$0xff]  ;;  %v65_v33 = vld [vmem:[%s3935_s1 + $0xd8] sm:$0xff] }
   0x9   :  { %v1670_v34 = vpack.c.bf16 %v63_v31, %v58_v29  ;;  %v69_v35 = vld [vmem:[%s3935_s1 + $0xf8] sm:$0xff]  ;;  %v74_v36 = vld [vmem:[%s3935_s1 + $0x120] sm:$0xff]  ;;  %v71_v37 = vld [vmem:[%s3935_s1 + $0x108] sm:$0xff]  ;;  %v1862_v38 = vpack.c.bf16 %v65_v33, %v60_v32 }
   0xa   :  { %1667 = vmatpush1.bf16.msra.mxu0 %v1666_v21  ;;  %1859 = vmatpush1.bf16.msra.mxu1 %v1858_v25  ;;  %v1672_v39 = vpack.c.bf16 %v74_v36, %v69_v35  ;;  %v76_v40 = vld [vmem:[%s3935_s1 + $0x130] sm:$0xff]  ;;  %v73_v42 = vld [vmem:[%s3935_s1 + $0x118] sm:$0xff]  ;;  %v70_v44 = vld [vmem:[%s3935_s1 + $0x100] sm:$0xff] }
   0xb   :  { %1669 = vmatprep.subr.bf16.mxu0 %v1668_v26  ;;  %v68_v41 = vld [vmem:[%s3935_s1 + $0xf0] sm:$0xff]  ;;  %1861 = vmatprep.subr.bf16.mxu1 %v1860_v30  ;;  %v1864_v43 = vpack.c.bf16 %v76_v40, %v71_v37  ;;  %v75_v45 = vld [vmem:[%s3935_s1 + $0x128] sm:$0xff]  ;;  %v81_v48 = vld [vmem:[%s3935_s1 + $0x158] sm:$0xff] }
   0xc   :  { %v79_v46 = vld [vmem:[%s3935_s1 + $0x148] sm:$0xff]  ;;  %v84_v47 = vld [vmem:[%s3935_s1 + $0x170] sm:$0xff]  ;;  %v86_v49 = vld [vmem:[%s3935_s1 + $0x180] sm:$0xff]  ;;  %v1674_v50 = vpack.c.bf16 %v73_v42, %v68_v41  ;;  %v1866_v51 = vpack.c.bf16 %v75_v45, %v70_v44 }
   0xd   :  { %v1676_v52 = vpack.c.bf16 %v84_v47, %v79_v46  ;;  %v78_v53 = vld [vmem:[%s3935_s1 + $0x140] sm:$0xff]  ;;  %v83_v54 = vld [vmem:[%s3935_s1 + $0x168] sm:$0xff]  ;;  %v80_v55 = vld [vmem:[%s3935_s1 + $0x150] sm:$0xff]  ;;  %v1868_v56 = vpack.c.bf16 %v86_v49, %v81_v48 }
   0xe   :  { %1671 = vmatpush1.bf16.msra.mxu0 %v1670_v34  ;;  %1863 = vmatpush1.bf16.msra.mxu1 %v1862_v38  ;;  %v85_v57 = vld [vmem:[%s3935_s1 + $0x178] sm:$0xff]  ;;  %v94_v59 = vld [vmem:[%s3935_s1 + $0x1c0] sm:$0xff]  ;;  %v91_v60 = vld [vmem:[%s3935_s1 + $0x1a8] sm:$0xff]  ;;  %v1678_v62 = vpack.c.bf16 %v83_v54, %v78_v53 }
   0xf   :  { %1673 = vmatprep.subr.bf16.mxu0 %v1672_v39  ;;  %1865 = vmatprep.subr.bf16.mxu1 %v1864_v43  ;;  %v89_v58 = vld [vmem:[%s3935_s1 + $0x198] sm:$0xff]  ;;  %v96_v61 = vld [vmem:[%s3935_s1 + $0x1d0] sm:$0xff]  ;;  %v1870_v63 = vpack.c.bf16 %v85_v57, %v80_v55  ;;  %v90_v3 = vld [vmem:[%s3935_s1 + $0x1a0] sm:$0xff] }
  0x10   :  { %v1680_v0 = vpack.c.bf16 %v94_v59, %v89_v58  ;;  %v88_v1 = vld [vmem:[%s3935_s1 + $0x190] sm:$0xff]  ;;  %v93_v2 = vld [vmem:[%s3935_s1 + $0x1b8] sm:$0xff]  ;;  %v1872_v4 = vpack.c.bf16 %v96_v61, %v91_v60  ;;  %v95_v5 = vld [vmem:[%s3935_s1 + $0x1c8] sm:$0xff] }
  0x11   :  { %v99_v6 = vld [vmem:[%s3935_s1 + $0x1e8] sm:$0xff]  ;;  %v104_v7 = vld [vmem:[%s3935_s1 + $0x210] sm:$0xff]  ;;  %v101_v8 = vld [vmem:[%s3935_s1 + $0x1f8] sm:$0xff]  ;;  %v1682_v10 = vpack.c.bf16 %v93_v2, %v88_v1  ;;  %v1874_v11 = vpack.c.bf16 %v95_v5, %v90_v3 }
  0x12   :  { %1675 = vmatpush1.bf16.msra.mxu0 %v1674_v50  ;;  %1867 = vmatpush1.bf16.msra.mxu1 %v1866_v51  ;;  %v106_v9 = vld [vmem:[%s3935_s1 + $0x220] sm:$0xff]  ;;  %v1684_v12 = vpack.c.bf16 %v104_v7, %v99_v6  ;;  %v103_v14 = vld [vmem:[%s3935_s1 + $0x208] sm:$0xff]  ;;  %v100_v15 = vld [vmem:[%s3935_s1 + $0x1f0] sm:$0xff] }
  0x13   :  { %1677 = vmatprep.subr.bf16.mxu0 %v1676_v52  ;;  %1869 = vmatprep.subr.bf16.mxu1 %v1868_v56  ;;  %v98_v13 = vld [vmem:[%s3935_s1 + $0x1e0] sm:$0xff]  ;;  %v1876_v16 = vpack.c.bf16 %v106_v9, %v101_v8  ;;  %v105_v17 = vld [vmem:[%s3935_s1 + $0x218] sm:$0xff]  ;;  %v111_v20 = vld [vmem:[%s3935_s1 + $0x248] sm:$0xff] }
  0x14   :  { %v109_v18 = vld [vmem:[%s3935_s1 + $0x238] sm:$0xff]  ;;  %v114_v19 = vld [vmem:[%s3935_s1 + $0x260] sm:$0xff]  ;;  %v116_v21 = vld [vmem:[%s3935_s1 + $0x270] sm:$0xff]  ;;  %v1686_v22 = vpack.c.bf16 %v103_v14, %v98_v13  ;;  %v1878_v23 = vpack.c.bf16 %v105_v17, %v100_v15 }
  0x15   :  { %v1688_v24 = vpack.c.bf16 %v114_v19, %v109_v18  ;;  %v108_v25 = vld [vmem:[%s3935_s1 + $0x230] sm:$0xff]  ;;  %v113_v26 = vld [vmem:[%s3935_s1 + $0x258] sm:$0xff]  ;;  %v110_v27 = vld [vmem:[%s3935_s1 + $0x240] sm:$0xff]  ;;  %v1880_v28 = vpack.c.bf16 %v116_v21, %v111_v20 }
  0x16   :  { %1679 = vmatpush1.bf16.msra.mxu0 %v1678_v62  ;;  %1871 = vmatpush1.bf16.msra.mxu1 %v1870_v63  ;;  %v115_v29 = vld [vmem:[%s3935_s1 + $0x268] sm:$0xff]  ;;  %v124_v31 = vld [vmem:[%s3935_s1 + $0x2b0] sm:$0xff]  ;;  %v121_v32 = vld [vmem:[%s3935_s1 + $0x298] sm:$0xff]  ;;  %v1690_v34 = vpack.c.bf16 %v113_v26, %v108_v25 }
  0x17   :  { %1681 = vmatprep.subr.bf16.mxu0 %v1680_v0  ;;  %1873 = vmatprep.subr.bf16.mxu1 %v1872_v4  ;;  %v119_v30 = vld [vmem:[%s3935_s1 + $0x288] sm:$0xff]  ;;  %v126_v33 = vld [vmem:[%s3935_s1 + $0x2c0] sm:$0xff]  ;;  %v1882_v35 = vpack.c.bf16 %v115_v29, %v110_v27  ;;  %v120_v39 = vld [vmem:[%s3935_s1 + $0x290] sm:$0xff] }
  0x18   :  { %v1692_v36 = vpack.c.bf16 %v124_v31, %v119_v30  ;;  %v118_v37 = vld [vmem:[%s3935_s1 + $0x280] sm:$0xff]  ;;  %v123_v38 = vld [vmem:[%s3935_s1 + $0x2a8] sm:$0xff]  ;;  %v1884_v40 = vpack.c.bf16 %v126_v33, %v121_v32  ;;  %v125_v41 = vld [vmem:[%s3935_s1 + $0x2b8] sm:$0xff] }
  0x19   :  { %v129_v42 = vld [vmem:[%s3935_s1 + $0x2d8] sm:$0xff]  ;;  %v134_v43 = vld [vmem:[%s3935_s1 + $0x300] sm:$0xff]  ;;  %v131_v44 = vld [vmem:[%s3935_s1 + $0x2e8] sm:$0xff]  ;;  %v1694_v46 = vpack.c.bf16 %v123_v38, %v118_v37  ;;  %v1886_v47 = vpack.c.bf16 %v125_v41, %v120_v39 }
  0x1a   :  { %1683 = vmatpush1.bf16.msra.mxu0 %v1682_v10  ;;  %1875 = vmatpush1.bf16.msra.mxu1 %v1874_v11  ;;  %v136_v45 = vld [vmem:[%s3935_s1 + $0x310] sm:$0xff]  ;;  %v1696_v48 = vpack.c.bf16 %v134_v43, %v129_v42  ;;  %v133_v50 = vld [vmem:[%s3935_s1 + $0x2f8] sm:$0xff]  ;;  %v130_v51 = vld [vmem:[%s3935_s1 + $0x2e0] sm:$0xff] }
  0x1b   :  { %1685 = vmatprep.subr.bf16.mxu0 %v1684_v12  ;;  %1877 = vmatprep.subr.bf16.mxu1 %v1876_v16  ;;  %v128_v49 = vld [vmem:[%s3935_s1 + $0x2d0] sm:$0xff]  ;;  %v1888_v52 = vpack.c.bf16 %v136_v45, %v131_v44  ;;  %v135_v53 = vld [vmem:[%s3935_s1 + $0x308] sm:$0xff]  ;;  %v141_v56 = vld [vmem:[%s3935_s1 + $0x338] sm:$0xff] }
  0x1c   :  { %v139_v54 = vld [vmem:[%s3935_s1 + $0x328] sm:$0xff]  ;;  %v144_v55 = vld [vmem:[%s3935_s1 + $0x350] sm:$0xff]  ;;  %v146_v57 = vld [vmem:[%s3935_s1 + $0x360] sm:$0xff]  ;;  %v1698_v58 = vpack.c.bf16 %v133_v50, %v128_v49  ;;  %v1890_v59 = vpack.c.bf16 %v135_v53, %v130_v51 }
  0x1d   :  { %v1700_v60 = vpack.c.bf16 %v144_v55, %v139_v54  ;;  %v138_v61 = vld [vmem:[%s3935_s1 + $0x320] sm:$0xff]  ;;  %v143_v62 = vld [vmem:[%s3935_s1 + $0x348] sm:$0xff]  ;;  %v140_v63 = vld [vmem:[%s3935_s1 + $0x330] sm:$0xff]  ;;  %v1892_v0 = vpack.c.bf16 %v146_v57, %v141_v56 }
  0x1e   :  { %1687 = vmatpush1.bf16.msra.mxu0 %v1686_v22  ;;  %1879 = vmatpush1.bf16.msra.mxu1 %v1878_v23  ;;  %v145_v1 = vld [vmem:[%s3935_s1 + $0x358] sm:$0xff]  ;;  %v154_v3 = vld [vmem:[%s3935_s1 + $0x3a0] sm:$0xff]  ;;  %v151_v4 = vld [vmem:[%s3935_s1 + $0x388] sm:$0xff]  ;;  %v1702_v6 = vpack.c.bf16 %v143_v62, %v138_v61 }
  0x1f   :  { %1689 = vmatprep.subr.bf16.mxu0 %v1688_v24  ;;  %1881 = vmatprep.subr.bf16.mxu1 %v1880_v28  ;;  %v149_v2 = vld [vmem:[%s3935_s1 + $0x378] sm:$0xff]  ;;  %v156_v5 = vld [vmem:[%s3935_s1 + $0x3b0] sm:$0xff]  ;;  %v1894_v8 = vpack.c.bf16 %v145_v1, %v140_v63  ;;  %v150_v11 = vld [vmem:[%s3935_s1 + $0x380] sm:$0xff] }
  0x20   :  { %v148_v7 = vld [vmem:[%s3935_s1 + $0x370] sm:$0xff]  ;;  %v1704_v9 = vpack.c.bf16 %v154_v3, %v149_v2  ;;  %v153_v10 = vld [vmem:[%s3935_s1 + $0x398] sm:$0xff]  ;;  %v155_v12 = vld [vmem:[%s3935_s1 + $0x3a8] sm:$0xff]  ;;  %v1896_v13 = vpack.c.bf16 %v156_v5, %v151_v4 }
  0x21   :  { %v159_v14 = vld [vmem:[%s3935_s1 + $0x3c8] sm:$0xff]  ;;  %v164_v15 = vld [vmem:[%s3935_s1 + $0x3f0] sm:$0xff]  ;;  %v161_v17 = vld [vmem:[%s3935_s1 + $0x3d8] sm:$0xff]  ;;  %v1706_v19 = vpack.c.bf16 %v153_v10, %v148_v7  ;;  %v1898_v20 = vpack.c.bf16 %v155_v12, %v150_v11 }
  0x22   :  { %1691 = vmatpush1.bf16.msra.mxu0 %v1690_v34  ;;  %1883 = vmatpush1.bf16.msra.mxu1 %v1882_v35  ;;  %v15_v16 = vld [vmem:[%s3936_s0 + $0x8] sm:$0xff]  ;;  %v166_v18 = vld [vmem:[%s3935_s1 + $0x400] sm:$0xff]  ;;  %v1708_v21 = vpack.c.bf16 %v164_v15, %v159_v14  ;;  %v160_v24 = vld [vmem:[%s3935_s1 + $0x3d0] sm:$0xff] }
  0x23   :  { %1693 = vmatprep.subr.bf16.mxu0 %v1692_v36  ;;  %1885 = vmatprep.subr.bf16.mxu1 %v1884_v40  ;;  %v158_v22 = vld [vmem:[%s3935_s1 + $0x3c0] sm:$0xff]  ;;  %v163_v23 = vld [vmem:[%s3935_s1 + $0x3e8] sm:$0xff]  ;;  %v1900_v25 = vpack.c.bf16 %v166_v18, %v161_v17  ;;  %v165_v26 = vld [vmem:[%s3935_s1 + $0x3f8] sm:$0xff] }
  0x24   :  { %631 = vmatprep.mubr.f32.mxu0 %v15_v16  ;;  %898 = vmatprep.mubr.f32.mxu1 %v15_v16  ;;  %v169_v27 = vld [vmem:[%s3935_s1 + $0x418] sm:$0xff]  ;;  %v174_v28 = vld [vmem:[%s3935_s1 + $0x440] sm:$0xff]  ;;  %v171_v29 = vld [vmem:[%s3935_s1 + $0x428] sm:$0xff]  ;;  %v1710_v31 = vpack.c.bf16 %v163_v23, %v158_v22  ;;  %v1902_v32 = vpack.c.bf16 %v165_v26, %v160_v24 }
  0x25   :  { %v176_v30 = vld [vmem:[%s3935_s1 + $0x450] sm:$0xff]  ;;  %v1712_v33 = vpack.c.bf16 %v174_v28, %v169_v27  ;;  %v173_v35 = vld [vmem:[%s3935_s1 + $0x438] sm:$0xff]  ;;  %v170_v36 = vld [vmem:[%s3935_s1 + $0x420] sm:$0xff] }
  0x26   :  { %1695 = vmatpush1.bf16.msra.mxu0 %v1694_v46  ;;  %1887 = vmatpush1.bf16.msra.mxu1 %v1886_v47  ;;  %v168_v34 = vld [vmem:[%s3935_s1 + $0x410] sm:$0xff]  ;;  %v1904_v37 = vpack.c.bf16 %v176_v30, %v171_v29  ;;  %v175_v38 = vld [vmem:[%s3935_s1 + $0x448] sm:$0xff]  ;;  %v181_v41 = vld [vmem:[%s3935_s1 + $0x478] sm:$0xff] }
  0x27   :  { %1697 = vmatprep.subr.bf16.mxu0 %v1696_v48  ;;  %1889 = vmatprep.subr.bf16.mxu1 %v1888_v52  ;;  %v179_v39 = vld [vmem:[%s3935_s1 + $0x468] sm:$0xff]  ;;  %v184_v40 = vld [vmem:[%s3935_s1 + $0x490] sm:$0xff]  ;;  %v186_v42 = vld [vmem:[%s3935_s1 + $0x4a0] sm:$0xff]  ;;  %v1714_v43 = vpack.c.bf16 %v173_v35, %v168_v34  ;;  %v1906_v44 = vpack.c.bf16 %v175_v38, %v170_v36 }
  0x28   :  { %v1716_v45 = vpack.c.bf16 %v184_v40, %v179_v39  ;;  %v178_v46 = vld [vmem:[%s3935_s1 + $0x460] sm:$0xff]  ;;  %v183_v47 = vld [vmem:[%s3935_s1 + $0x488] sm:$0xff]  ;;  %v180_v48 = vld [vmem:[%s3935_s1 + $0x470] sm:$0xff]  ;;  %v1908_v49 = vpack.c.bf16 %v186_v42, %v181_v41 }
  0x29   :  { %v185_v50 = vld [vmem:[%s3935_s1 + $0x498] sm:$0xff]  ;;  %v194_v52 = vld [vmem:[%s3935_s1 + $0x4e0] sm:$0xff]  ;;  %v191_v53 = vld [vmem:[%s3935_s1 + $0x4c8] sm:$0xff]  ;;  %v1718_v55 = vpack.c.bf16 %v183_v47, %v178_v46 }
  0x2a   :  { %1699 = vmatpush1.bf16.msra.mxu0 %v1698_v58  ;;  %1891 = vmatpush1.bf16.msra.mxu1 %v1890_v59  ;;  %v189_v51 = vld [vmem:[%s3935_s1 + $0x4b8] sm:$0xff]  ;;  %v196_v54 = vld [vmem:[%s3935_s1 + $0x4f0] sm:$0xff]  ;;  %v1910_v56 = vpack.c.bf16 %v185_v50, %v180_v48  ;;  %v195_v62 = vld [vmem:[%s3935_s1 + $0x4e8] sm:$0xff] }
  0x2b   :  { %1701 = vmatprep.subr.bf16.mxu0 %v1700_v60  ;;  %1893 = vmatprep.subr.bf16.mxu1 %v1892_v0  ;;  %v1720_v57 = vpack.c.bf16 %v194_v52, %v189_v51  ;;  %v188_v58 = vld [vmem:[%s3935_s1 + $0x4b0] sm:$0xff]  ;;  %v193_v59 = vld [vmem:[%s3935_s1 + $0x4d8] sm:$0xff]  ;;  %v190_v60 = vld [vmem:[%s3935_s1 + $0x4c0] sm:$0xff]  ;;  %v1912_v61 = vpack.c.bf16 %v196_v54, %v191_v53 }
  0x2c   :  { %v199_v63 = vld [vmem:[%s3935_s1 + $0x508] sm:$0xff]  ;;  %v204_v0 = vld [vmem:[%s3935_s1 + $0x530] sm:$0xff]  ;;  %v201_v1 = vld [vmem:[%s3935_s1 + $0x518] sm:$0xff]  ;;  %v1722_v3 = vpack.c.bf16 %v193_v59, %v188_v58  ;;  %v1914_v4 = vpack.c.bf16 %v195_v62, %v190_v60 }
  0x2d   :  { %v206_v2 = vld [vmem:[%s3935_s1 + $0x540] sm:$0xff]  ;;  %v1724_v5 = vpack.c.bf16 %v204_v0, %v199_v63  ;;  %v203_v7 = vld [vmem:[%s3935_s1 + $0x528] sm:$0xff]  ;;  %v205_v10 = vld [vmem:[%s3935_s1 + $0x538] sm:$0xff] }
  0x2e   :  { %1703 = vmatpush1.bf16.msra.mxu0 %v1702_v6  ;;  %1895 = vmatpush1.bf16.msra.mxu1 %v1894_v8  ;;  %v198_v6 = vld [vmem:[%s3935_s1 + $0x500] sm:$0xff]  ;;  %v200_v8 = vld [vmem:[%s3935_s1 + $0x510] sm:$0xff]  ;;  %v209_v11 = vld [vmem:[%s3935_s1 + $0x558] sm:$0xff] }
  0x2f   :  { %1705 = vmatprep.subr.bf16.mxu0 %v1704_v9  ;;  %1897 = vmatprep.subr.bf16.mxu1 %v1896_v13  ;;  %v1916_v9 = vpack.c.bf16 %v206_v2, %v201_v1  ;;  %v214_v12 = vld [vmem:[%s3935_s1 + $0x580] sm:$0xff]  ;;  %v211_v13 = vld [vmem:[%s3935_s1 + $0x568] sm:$0xff]  ;;  %v216_v14 = vld [vmem:[%s3935_s1 + $0x590] sm:$0xff]  ;;  %v1726_v16 = vpack.c.bf16 %v203_v7, %v198_v6  ;;  %v1918_v17 = vpack.c.bf16 %v205_v10, %v200_v8 }
  0x30   :  { %v14_v15 = vld [vmem:[%s3936_s0] sm:$0xff]  ;;  %v1728_v18 = vpack.c.bf16 %v214_v12, %v209_v11  ;;  %v1920_v22 = vpack.c.bf16 %v216_v14, %v211_v13  ;;  %v215_v23 = vld [vmem:[%s3935_s1 + $0x588] sm:$0xff]  ;;  %v221_v26 = vld [vmem:[%s3935_s1 + $0x5b8] sm:$0xff] }
  0x31   :  { %v219_v24 = vld [vmem:[%s3935_s1 + $0x5a8] sm:$0xff]  ;;  %v226_v27 = vld [vmem:[%s3935_s1 + $0x5e0] sm:$0xff]  ;;  %v225_v35 = vld [vmem:[%s3935_s1 + $0x5d8] sm:$0xff] }
  0x32   :  { %1707 = vmatpush1.bf16.msra.mxu0 %v1706_v19  ;;  %1899 = vmatpush1.bf16.msra.mxu1 %v1898_v20  ;;  %v208_v19 = vld [vmem:[%s3935_s1 + $0x550] sm:$0xff]  ;;  %v213_v20 = vld [vmem:[%s3935_s1 + $0x578] sm:$0xff]  ;;  %v1924_v34 = vpack.c.bf16 %v226_v27, %v221_v26  ;;  %v231_v38 = vld [vmem:[%s3935_s1 + $0x608] sm:$0xff] }
  0x33   :  { %1709 = vmatprep.subr.bf16.mxu0 %v1708_v21  ;;  %1901 = vmatprep.subr.bf16.mxu1 %v1900_v25  ;;  %v210_v21 = vld [vmem:[%s3935_s1 + $0x560] sm:$0xff]  ;;  %v224_v25 = vld [vmem:[%s3935_s1 + $0x5d0] sm:$0xff]  ;;  %v1730_v28 = vpack.c.bf16 %v213_v20, %v208_v19  ;;  %v229_v36 = vld [vmem:[%s3935_s1 + $0x5f8] sm:$0xff] }
  0x34   :  { %v1922_v29 = vpack.c.bf16 %v215_v23, %v210_v21  ;;  %v1732_v30 = vpack.c.bf16 %v224_v25, %v219_v24  ;;  %v236_v39 = vld [vmem:[%s3935_s1 + $0x630] sm:$0xff]  ;;  %v235_v47 = vld [vmem:[%s3935_s1 + $0x628] sm:$0xff]  ;;  %v241_v50 = vld [vmem:[%s3935_s1 + $0x658] sm:$0xff] }
  0x35   :  { %v1928_v46 = vpack.c.bf16 %v236_v39, %v231_v38  ;;  %v239_v48 = vld [vmem:[%s3935_s1 + $0x648] sm:$0xff]  ;;  %v246_v51 = vld [vmem:[%s3935_s1 + $0x680] sm:$0xff]  ;;  %v245_v58 = vld [vmem:[%s3935_s1 + $0x678] sm:$0xff] }
  0x36   :  { %1711 = vmatpush1.bf16.msra.mxu0 %v1710_v31  ;;  %1903 = vmatpush1.bf16.msra.mxu1 %v1902_v32  ;;  %v218_v31 = vld [vmem:[%s3935_s1 + $0x5a0] sm:$0xff]  ;;  %v223_v32 = vld [vmem:[%s3935_s1 + $0x5c8] sm:$0xff]  ;;  %v1932_v59 = vpack.c.bf16 %v246_v51, %v241_v50  ;;  %v249_v60 = vld [vmem:[%s3935_s1 + $0x698] sm:$0xff] }
  0x37   :  { %1713 = vmatprep.subr.bf16.mxu0 %v1712_v33  ;;  %1905 = vmatprep.subr.bf16.mxu1 %v1904_v37  ;;  %v220_v33 = vld [vmem:[%s3935_s1 + $0x5b0] sm:$0xff]  ;;  %v234_v37 = vld [vmem:[%s3935_s1 + $0x620] sm:$0xff]  ;;  %v1734_v40 = vpack.c.bf16 %v223_v32, %v218_v31  ;;  %v21_v62 = vld [vmem:[%s3936_s0 + $0x38] sm:$0xff] }
  0x38   :  { %v1926_v41 = vpack.c.bf16 %v225_v35, %v220_v33  ;;  %v1736_v42 = vpack.c.bf16 %v234_v37, %v229_v36  ;;  %v238_v53 = vld [vmem:[%s3935_s1 + $0x640] sm:$0xff]  ;;  %v251_v63 = vld [vmem:[%s3935_s1 + $0x6a8] sm:$0xff]  ;;  %v256_v0 = vld [vmem:[%s3935_s1 + $0x6d0] sm:$0xff] }
  0x39   :  { %v20_v1 = vld [vmem:[%s3936_s0 + $0x30] sm:$0xff]  ;;  %v253_v6 = vld [vmem:[%s3935_s1 + $0x6b8] sm:$0xff]  ;;  %v250_v7 = vld [vmem:[%s3935_s1 + $0x6a0] sm:$0xff] }
  0x3a   :  { %1715 = vmatpush1.bf16.msra.mxu0 %v1714_v43  ;;  %1907 = vmatpush1.bf16.msra.mxu1 %v1906_v44  ;;  %v228_v43 = vld [vmem:[%s3935_s1 + $0x5f0] sm:$0xff]  ;;  %v233_v44 = vld [vmem:[%s3935_s1 + $0x618] sm:$0xff]  ;;  %v27_v8 = vld [vmem:[%s3936_s0 + $0x68] sm:$0xff] }
  0x3b   :  { %1717 = vmatprep.subr.bf16.mxu0 %v1716_v45  ;;  %1909 = vmatprep.subr.bf16.mxu1 %v1908_v49  ;;  %v230_v45 = vld [vmem:[%s3935_s1 + $0x600] sm:$0xff]  ;;  %v244_v49 = vld [vmem:[%s3935_s1 + $0x670] sm:$0xff]  ;;  %v1738_v52 = vpack.c.bf16 %v233_v44, %v228_v43  ;;  %v255_v10 = vld [vmem:[%s3935_s1 + $0x6c8] sm:$0xff] }
  0x3c   :  { %v1930_v54 = vpack.c.bf16 %v235_v47, %v230_v45  ;;  %v259_v11 = vld [vmem:[%s3935_s1 + $0x6e8] sm:$0xff]  ;;  %v264_v12 = vld [vmem:[%s3935_s1 + $0x710] sm:$0xff]  ;;  %v261_v13 = vld [vmem:[%s3935_s1 + $0x6f8] sm:$0xff]  ;;  %v1938_v19 = vpack.c.bf16 %v255_v10, %v250_v7 }
  0x3d   :  { %v266_v14 = vld [vmem:[%s3935_s1 + $0x720] sm:$0xff]  ;;  %v1748_v20 = vpack.c.bf16 %v264_v12, %v259_v11  ;;  %v263_v21 = vld [vmem:[%s3935_s1 + $0x708] sm:$0xff]  ;;  %v265_v23 = vld [vmem:[%s3935_s1 + $0x718] sm:$0xff] }
  0x3e   :  { %1719 = vmatpush1.bf16.msra.mxu0 %v1718_v55  ;;  %1911 = vmatpush1.bf16.msra.mxu1 %v1910_v56  ;;  %v1740_v55 = vpack.c.bf16 %v244_v49, %v239_v48  ;;  %v243_v56 = vld [vmem:[%s3935_s1 + $0x668] sm:$0xff]  ;;  %v1940_v24 = vpack.c.bf16 %v266_v14, %v261_v13  ;;  %v269_v25 = vld [vmem:[%s3935_s1 + $0x738] sm:$0xff]  ;;  %v274_v26 = vld [vmem:[%s3935_s1 + $0x760] sm:$0xff] }
  0x3f   :  { %1721 = vmatprep.subr.bf16.mxu0 %v1720_v57  ;;  %1913 = vmatprep.subr.bf16.mxu1 %v1912_v61  ;;  %v240_v57 = vld [vmem:[%s3935_s1 + $0x650] sm:$0xff]  ;;  %v254_v61 = vld [vmem:[%s3935_s1 + $0x6c0] sm:$0xff]  ;;  %v1742_v2 = vpack.c.bf16 %v243_v56, %v238_v53  ;;  %v17_v31 = vld [vmem:[%s3936_s0 + $0x18] sm:$0xff]  ;;  %v1752_v33 = vpack.c.bf16 %v274_v26, %v269_v25 }
  0x40   :  { %v32_v27 = vld [vmem:[%s3936_s0 + $0x90] sm:$0xff]  ;;  %v273_v35 = vld [vmem:[%s3935_s1 + $0x758] sm:$0xff]  ;;  %v270_v36 = vld [vmem:[%s3935_s1 + $0x740] sm:$0xff] }
  0x41   :  { %v275_v38 = vld [vmem:[%s3935_s1 + $0x768] sm:$0xff]  ;;  %v280_v48 = vld [vmem:[%s3935_s1 + $0x790] sm:$0xff]  ;;  %v285_v50 = vld [vmem:[%s3935_s1 + $0x7b8] sm:$0xff] }
  0x42   :  { %1723 = vmatpush1.bf16.msra.mxu0 %v1722_v3  ;;  %1915 = vmatpush1.bf16.msra.mxu1 %v1914_v4  ;;  %v248_v3 = vld [vmem:[%s3935_s1 + $0x690] sm:$0xff]  ;;  %v1934_v4 = vpack.c.bf16 %v245_v58, %v240_v57  ;;  %v279_v39 = vld [vmem:[%s3935_s1 + $0x788] sm:$0xff]  ;;  %v1946_v44 = vpack.c.bf16 %v275_v38, %v270_v36  ;;  %v289_v51 = vld [vmem:[%s3935_s1 + $0x7d8] sm:$0xff]  ;;  %v1950_v56 = vpack.c.bf16 %v285_v50, %v280_v48 }
  0x43   :  { %1725 = vmatprep.subr.bf16.mxu0 %v1724_v5  ;;  %1917 = vmatprep.subr.bf16.mxu1 %v1916_v9  ;;  %v1744_v5 = vpack.c.bf16 %v254_v61, %v249_v60  ;;  %v1936_v9 = vpack.c.bf16 %v256_v0, %v251_v63  ;;  %v283_v47 = vld [vmem:[%s3935_s1 + $0x7a8] sm:$0xff]  ;;  %v288_v58 = vld [vmem:[%s3935_s1 + $0x7d0] sm:$0xff]  ;;  %v290_v60 = vld [vmem:[%s3935_s1 + $0x7e0] sm:$0xff] }
  0x44   :  { %v291_v53 = vld [vmem:[%s3935_s1 + $0x7e8] sm:$0xff]  ;;  %v304_v0 = vld [vmem:[%s3935_s1 + $0x850] sm:$0xff]  ;;  %v305_v10 = vld [vmem:[%s3935_s1 + $0x858] sm:$0xff] }
  0x45   :  { %632 = vmatmul.mubr.f32.vlgmr.msra.gmra.mrb[0].mxu0 %v14_v15  ;;  %899 = vmatmul.mubr.f32.vlgmr.msra.gmra.mrb[0].mxu1 %v14_v15  ;;  %v26_v15 = vld [vmem:[%s3936_s0 + $0x60] sm:$0xff]  ;;  %v299_v63 = vld [vmem:[%s3935_s1 + $0x828] sm:$0xff]  ;;  %v309_v11 = vld [vmem:[%s3935_s1 + $0x878] sm:$0xff] }
  0x46   :  { %1727 = vmatpush1.bf16.msra.mxu0 %v1726_v16  ;;  %1919 = vmatpush1.bf16.msra.mxu1 %v1918_v17  ;;  %v1746_v16 = vpack.c.bf16 %v253_v6, %v248_v3  ;;  %v258_v17 = vld [vmem:[%s3935_s1 + $0x6e0] sm:$0xff]  ;;  %v303_v7 = vld [vmem:[%s3935_s1 + $0x848] sm:$0xff]  ;;  %v316_v14 = vld [vmem:[%s3935_s1 + $0x8b0] sm:$0xff] }
  0x47   :  { %1729 = vmatprep.subr.bf16.mxu0 %v1728_v18  ;;  %1921 = vmatprep.subr.bf16.mxu1 %v1920_v22  ;;  %v33_v18 = vld [vmem:[%s3936_s0 + $0x98] sm:$0xff]  ;;  %v260_v22 = vld [vmem:[%s3935_s1 + $0x6f0] sm:$0xff]  ;;  %v298_v6 = vld [vmem:[%s3935_s1 + $0x820] sm:$0xff] }
  0x48   :  { %637 = vmatprep.mubr.f32.mxu0 %v21_v62  ;;  %904 = vmatprep.mubr.f32.mxu1 %v21_v62  ;;  %v1942_v32 = vpack.c.bf16 %v265_v23, %v260_v22  ;;  %v295_v62 = vld [vmem:[%s3935_s1 + $0x808] sm:$0xff]  ;;  %v314_v12 = vld [vmem:[%s3935_s1 + $0x8a0] sm:$0xff]  ;;  %v321_v25 = vld [vmem:[%s3935_s1 + $0x8d8] sm:$0xff] }
  0x49   :  { %905 = vmatmul.mubr.f32.gmra.mrb[2].mxu1 %v20_v1  ;;  %638 = vmatmul.mubr.f32.gmra.mrb[2].mxu0 %v20_v1  ;;  %v301_v1 = vld [vmem:[%s3935_s1 + $0x838] sm:$0xff]  ;;  %v311_v13 = vld [vmem:[%s3935_s1 + $0x888] sm:$0xff]  ;;  %v326_v26 = vld [vmem:[%s3935_s1 + $0x900] sm:$0xff] }
  0x4a   :  { %1731 = vmatpush1.bf16.msra.mxu0 %v1730_v28  ;;  %1923 = vmatpush1.bf16.msra.mxu1 %v1922_v29  ;;  %v271_v28 = vld [vmem:[%s3935_s1 + $0x748] sm:$0xff]  ;;  %v276_v29 = vld [vmem:[%s3935_s1 + $0x770] sm:$0xff]  ;;  %v334_v36 = vld [vmem:[%s3935_s1 + $0x940] sm:$0xff] }
  0x4b   :  { %1733 = vmatprep.subr.bf16.mxu0 %v1732_v30  ;;  %1925 = vmatprep.subr.bf16.mxu1 %v1924_v34  ;;  %v1750_v30 = vpack.c.bf16 %v263_v21, %v258_v17  ;;  %v268_v34 = vld [vmem:[%s3935_s1 + $0x730] sm:$0xff]  ;;  %v1944_v37 = vpack.c.bf16 %v276_v29, %v271_v28  ;;  %v1768_v17 = vpack.c.bf16 %v314_v12, %v309_v11  ;;  %v315_v22 = vld [vmem:[%s3935_s1 + $0x8a8] sm:$0xff]  ;;  %v346_v50 = vld [vmem:[%s3935_s1 + $0x9a0] sm:$0xff] }
  0x4c   :  { %643 = vmatprep.mubr.f32.mxu0 %v27_v8  ;;  %910 = vmatprep.mubr.f32.mxu1 %v27_v8  ;;  %v1754_v43 = vpack.c.bf16 %v273_v35, %v268_v34  ;;  %v300_v8 = vld [vmem:[%s3935_s1 + $0x830] sm:$0xff]  ;;  %v1960_v21 = vpack.c.bf16 %v316_v14, %v311_v13  ;;  %v319_v23 = vld [vmem:[%s3935_s1 + $0x8c8] sm:$0xff]  ;;  %v325_v34 = vld [vmem:[%s3935_s1 + $0x8f8] sm:$0xff] }
  0x4d   :  { %911 = vmatmul.mubr.f32.gmra.mrb[4].mxu1 %v26_v15  ;;  %644 = vmatmul.mubr.f32.gmra.mrb[4].mxu0 %v26_v15  ;;  %v1766_v15 = vpack.c.bf16 %v303_v7, %v298_v6  ;;  %v329_v35 = vld [vmem:[%s3935_s1 + $0x918] sm:$0xff]  ;;  %v336_v38 = vld [vmem:[%s3935_s1 + $0x950] sm:$0xff]  ;;  %v355_v6 = vld [vmem:[%s3935_s1 + $0x9e8] sm:$0xff] }
  0x4e   :  { %1735 = vmatpush1.bf16.msra.mxu0 %v1734_v40  ;;  %1927 = vmatpush1.bf16.msra.mxu1 %v1926_v41  ;;  %v284_v40 = vld [vmem:[%s3935_s1 + $0x7b0] sm:$0xff]  ;;  %v281_v41 = vld [vmem:[%s3935_s1 + $0x798] sm:$0xff]  ;;  %v359_v7 = vld [vmem:[%s3935_s1 + $0xa08] sm:$0xff] }
  0x4f   :  { %1737 = vmatprep.subr.bf16.mxu0 %v1736_v42  ;;  %1929 = vmatprep.subr.bf16.mxu1 %v1928_v46  ;;  %v286_v42 = vld [vmem:[%s3935_s1 + $0x7c0] sm:$0xff]  ;;  %v1756_v45 = vpack.c.bf16 %v284_v40, %v279_v39  ;;  %v344_v48 = vld [vmem:[%s3935_s1 + $0x990] sm:$0xff] }
  0x50   :  { %649 = vmatprep.mubr.f32.mxu0 %v33_v18  ;;  %916 = vmatprep.mubr.f32.mxu1 %v33_v18  ;;  %v278_v46 = vld [vmem:[%s3935_s1 + $0x780] sm:$0xff]  ;;  %v1948_v49 = vpack.c.bf16 %v286_v42, %v281_v41  ;;  %v308_v18 = vld [vmem:[%s3935_s1 + $0x870] sm:$0xff]  ;;  %v1776_v41 = vpack.c.bf16 %v334_v36, %v329_v35  ;;  %v3101_v36 = vld [vmem:[%s3936_s0 + $0x48] sm:$0xff] }
  0x51   :  { %917 = vmatmul.mubr.f32.gmra.mrb[6].mxu1 %v32_v27  ;;  %650 = vmatmul.mubr.f32.gmra.mrb[6].mxu0 %v32_v27  ;;  %v328_v42 = vld [vmem:[%s3935_s1 + $0x910] sm:$0xff]  ;;  %v358_v14 = vld [vmem:[%s3935_s1 + $0xa00] sm:$0xff] }
  0x52   :  { %1739 = vmatpush1.bf16.msra.mxu0 %v1738_v52  ;;  %1931 = vmatpush1.bf16.msra.mxu1 %v1930_v54  ;;  %v294_v52 = vld [vmem:[%s3935_s1 + $0x800] sm:$0xff]  ;;  %v296_v54 = vld [vmem:[%s3935_s1 + $0x810] sm:$0xff] }
  0x53   :  { %1741 = vmatprep.subr.bf16.mxu0 %v1740_v55  ;;  %1933 = vmatprep.subr.bf16.mxu1 %v1932_v59  ;;  %v1758_v55 = vpack.c.bf16 %v283_v47, %v278_v46  ;;  %v1760_v57 = vpack.c.bf16 %v294_v52, %v289_v51  ;;  %v293_v59 = vld [vmem:[%s3935_s1 + $0x7f8] sm:$0xff]  ;;  %v1952_v61 = vpack.c.bf16 %v296_v54, %v291_v53  ;;  %v335_v46 = vld [vmem:[%s3935_s1 + $0x948] sm:$0xff]  ;;  %v338_v54 = vld [vmem:[%s3935_s1 + $0x960] sm:$0xff] }
  0x54   :  { %720 = vmatprep.mubr.f32.mxu0 %v17_v31  ;;  %987 = vmatprep.mubr.f32.mxu1 %v17_v31  ;;  %v1762_v3 = vpack.c.bf16 %v293_v59, %v288_v58  ;;  %v323_v31 = vld [vmem:[%s3935_s1 + $0x8e8] sm:$0xff]  ;;  %v345_v58 = vld [vmem:[%s3935_s1 + $0x998] sm:$0xff]  ;;  %v386_v35 = vld [vmem:[%s3935_s1 + $0xae0] sm:$0xff] }
  0x55   :  { %v339_v47 = vld [vmem:[%s3935_s1 + $0x968] sm:$0xff]  ;;  %v349_v59 = vld [vmem:[%s3935_s1 + $0x9b8] sm:$0xff] }
  0x56   :  { %1743 = vmatpush1.bf16.msra.mxu0 %v1742_v2  ;;  %1935 = vmatpush1.bf16.msra.mxu1 %v1934_v4  ;;  %v306_v2 = vld [vmem:[%s3935_s1 + $0x860] sm:$0xff]  ;;  %v1954_v4 = vpack.c.bf16 %v295_v62, %v290_v60  ;;  %v1780_v53 = vpack.c.bf16 %v344_v48, %v339_v47  ;;  %v356_v62 = vld [vmem:[%s3935_s1 + $0x9f0] sm:$0xff]  ;;  %v391_v48 = vld [vmem:[%s3935_s1 + $0xb08] sm:$0xff] }
  0x57   :  { %1745 = vmatprep.subr.bf16.mxu0 %v1744_v5  ;;  %1937 = vmatprep.subr.bf16.mxu1 %v1936_v9  ;;  %v1764_v5 = vpack.c.bf16 %v304_v0, %v299_v63  ;;  %v1956_v9 = vpack.c.bf16 %v306_v2, %v301_v1  ;;  %v354_v60 = vld [vmem:[%s3935_s1 + $0x9e0] sm:$0xff]  ;;  %v348_v2 = vld [vmem:[%s3935_s1 + $0x9b0] sm:$0xff] }
  0x58   :  { %v1784_v1 = vpack.c.bf16 %v354_v60, %v349_v59  ;;  %v394_v47 = vld [vmem:[%s3935_s1 + $0xb20] sm:$0xff]  ;;  %v395_v59 = vld [vmem:[%s3935_s1 + $0xb28] sm:$0xff] }
  0x59   :  { %v399_v60 = vld [vmem:[%s3935_s1 + $0xb48] sm:$0xff] }
  0x5a   :  { %1747 = vmatpush1.bf16.msra.mxu0 %v1746_v16  ;;  %1939 = vmatpush1.bf16.msra.mxu1 %v1938_v19  ;;  %v1958_v16 = vpack.c.bf16 %v305_v10, %v300_v8  ;;  %v313_v19 = vld [vmem:[%s3935_s1 + $0x898] sm:$0xff]  ;;  %v364_v8 = vld [vmem:[%s3935_s1 + $0xa30] sm:$0xff]  ;;  %v366_v10 = vld [vmem:[%s3935_s1 + $0xa40] sm:$0xff] }
  0x5b   :  { %1749 = vmatprep.subr.bf16.mxu0 %v1748_v20  ;;  %1941 = vmatprep.subr.bf16.mxu1 %v1940_v24  ;;  %v310_v20 = vld [vmem:[%s3935_s1 + $0x880] sm:$0xff]  ;;  %v324_v24 = vld [vmem:[%s3935_s1 + $0x8f0] sm:$0xff]  ;;  %v1770_v27 = vpack.c.bf16 %v313_v19, %v308_v18  ;;  %v1788_v13 = vpack.c.bf16 %v364_v8, %v359_v7  ;;  %v365_v18 = vld [vmem:[%s3935_s1 + $0xa38] sm:$0xff] }
  0x5c   :  { %v1962_v28 = vpack.c.bf16 %v315_v22, %v310_v20  ;;  %v1772_v29 = vpack.c.bf16 %v324_v24, %v319_v23  ;;  %v369_v19 = vld [vmem:[%s3935_s1 + $0xa58] sm:$0xff]  ;;  %v374_v20 = vld [vmem:[%s3935_s1 + $0xa80] sm:$0xff]  ;;  %v376_v22 = vld [vmem:[%s3935_s1 + $0xa90] sm:$0xff] }
  0x5d   :  { %v3071_v23 = vld [vmem:[%s3936_s0 + $0x10] sm:$0xff] }
  0x5e   :  { %1751 = vmatpush1.bf16.msra.mxu0 %v1750_v30  ;;  %1943 = vmatpush1.bf16.msra.mxu1 %v1942_v32  ;;  %v318_v30 = vld [vmem:[%s3935_s1 + $0x8c0] sm:$0xff]  ;;  %v320_v32 = vld [vmem:[%s3935_s1 + $0x8d0] sm:$0xff] }
  0x5f   :  { %1753 = vmatprep.subr.bf16.mxu0 %v1752_v33  ;;  %1945 = vmatprep.subr.bf16.mxu1 %v1944_v37  ;;  %v1964_v33 = vpack.c.bf16 %v326_v26, %v321_v25  ;;  %v331_v37 = vld [vmem:[%s3935_s1 + $0x928] sm:$0xff]  ;;  %v1774_v39 = vpack.c.bf16 %v323_v31, %v318_v30  ;;  %v1966_v40 = vpack.c.bf16 %v325_v34, %v320_v32  ;;  %v381_v34 = vld [vmem:[%s3935_s1 + $0xab8] sm:$0xff]  ;;  %v400_v7 = vld [vmem:[%s3935_s1 + $0xb50] sm:$0xff] }
  0x60   :  { %v1792_v26 = vpack.c.bf16 %v374_v20, %v369_v19  ;;  %v375_v31 = vld [vmem:[%s3935_s1 + $0xa88] sm:$0xff]  ;;  %v413_v19 = vld [vmem:[%s3935_s1 + $0xbb8] sm:$0xff]  ;;  %v410_v20 = vld [vmem:[%s3935_s1 + $0xba0] sm:$0xff] }
  0x61   :  { %v379_v32 = vld [vmem:[%s3935_s1 + $0xaa8] sm:$0xff] }
  0x62   :  { %1755 = vmatpush1.bf16.msra.mxu0 %v1754_v43  ;;  %1947 = vmatpush1.bf16.msra.mxu1 %v1946_v44  ;;  %v333_v43 = vld [vmem:[%s3935_s1 + $0x938] sm:$0xff]  ;;  %v330_v44 = vld [vmem:[%s3935_s1 + $0x920] sm:$0xff] }
  0x63   :  { %1757 = vmatprep.subr.bf16.mxu0 %v1756_v45  ;;  %1949 = vmatprep.subr.bf16.mxu1 %v1948_v49  ;;  %v1968_v45 = vpack.c.bf16 %v336_v38, %v331_v37  ;;  %v341_v49 = vld [vmem:[%s3935_s1 + $0x978] sm:$0xff]  ;;  %v1778_v51 = vpack.c.bf16 %v333_v43, %v328_v42  ;;  %v1970_v52 = vpack.c.bf16 %v335_v46, %v330_v44  ;;  %v3107_v38 = vld [vmem:[%s3936_s0 + $0x40] sm:$0xff]  ;;  %v383_v42 = vld [vmem:[%s3935_s1 + $0xac8] sm:$0xff] }
  0x64   :  { %v380_v43 = vld [vmem:[%s3935_s1 + $0xab0] sm:$0xff]  ;;  %v1988_v44 = vpack.c.bf16 %v386_v35, %v381_v34  ;;  %v389_v46 = vld [vmem:[%s3935_s1 + $0xaf8] sm:$0xff] }
  0x65   :  { %v425_v35 = vld [vmem:[%s3935_s1 + $0xc18] sm:$0xff] }
  0x66   :  { %1759 = vmatpush1.bf16.msra.mxu0 %v1758_v55  ;;  %1951 = vmatpush1.bf16.msra.mxu1 %v1950_v56  ;;  %v343_v55 = vld [vmem:[%s3935_s1 + $0x988] sm:$0xff]  ;;  %v340_v56 = vld [vmem:[%s3935_s1 + $0x970] sm:$0xff] }
  0x67   :  { %1761 = vmatprep.subr.bf16.mxu0 %v1760_v57  ;;  %1953 = vmatprep.subr.bf16.mxu1 %v1952_v61  ;;  %v1972_v57 = vpack.c.bf16 %v346_v50, %v341_v49  ;;  %v351_v61 = vld [vmem:[%s3935_s1 + $0x9c8] sm:$0xff]  ;;  %v1782_v63 = vpack.c.bf16 %v343_v55, %v338_v54  ;;  %v1974_v0 = vpack.c.bf16 %v345_v58, %v340_v56  ;;  %v396_v49 = vld [vmem:[%s3935_s1 + $0xb30] sm:$0xff]  ;;  %v3139_v50 = vld [vmem:[%s3936_s0 + $0x78] sm:$0xff] }
  0x68   :  { %v1800_v54 = vpack.c.bf16 %v394_v47, %v389_v46  ;;  %v388_v55 = vld [vmem:[%s3935_s1 + $0xaf0] sm:$0xff]  ;;  %v393_v56 = vld [vmem:[%s3935_s1 + $0xb18] sm:$0xff]  ;;  %v1992_v58 = vpack.c.bf16 %v396_v49, %v391_v48  ;;  %v430_v47 = vld [vmem:[%s3935_s1 + $0xc40] sm:$0xff] }
  0x69   :  { %v433_v46 = vld [vmem:[%s3935_s1 + $0xc58] sm:$0xff]  ;;  %v435_v49 = vld [vmem:[%s3935_s1 + $0xc68] sm:$0xff] }
  0x6a   :  { %1763 = vmatpush1.bf16.msra.mxu0 %v1762_v3  ;;  %1955 = vmatpush1.bf16.msra.mxu1 %v1954_v4  ;;  %v353_v3 = vld [vmem:[%s3935_s1 + $0x9d8] sm:$0xff]  ;;  %v350_v4 = vld [vmem:[%s3935_s1 + $0x9c0] sm:$0xff] }
  0x6b   :  { %1765 = vmatprep.subr.bf16.mxu0 %v1764_v5  ;;  %1957 = vmatprep.subr.bf16.mxu1 %v1956_v9  ;;  %v1976_v5 = vpack.c.bf16 %v356_v62, %v351_v61  ;;  %v361_v9 = vld [vmem:[%s3935_s1 + $0xa18] sm:$0xff]  ;;  %v1786_v11 = vpack.c.bf16 %v353_v3, %v348_v2  ;;  %v1978_v12 = vpack.c.bf16 %v355_v6, %v350_v4  ;;  %v404_v61 = vld [vmem:[%s3935_s1 + $0xb70] sm:$0xff]  ;;  %v3183_v2 = vld [vmem:[%s3936_s0 + $0xa0] sm:$0xff] }
  0x6c   :  { %v401_v62 = vld [vmem:[%s3935_s1 + $0xb58] sm:$0xff]  ;;  %v1804_v4 = vpack.c.bf16 %v404_v61, %v399_v60  ;;  %v403_v6 = vld [vmem:[%s3935_s1 + $0xb68] sm:$0xff]  ;;  %v440_v61 = vld [vmem:[%s3935_s1 + $0xc90] sm:$0xff] }
  0x6d   :  { %v443_v60 = vld [vmem:[%s3935_s1 + $0xca8] sm:$0xff] }
  0x6e   :  { %1767 = vmatpush1.bf16.msra.mxu0 %v1766_v15  ;;  %1959 = vmatpush1.bf16.msra.mxu1 %v1958_v16  ;;  %v363_v15 = vld [vmem:[%s3935_s1 + $0xa28] sm:$0xff]  ;;  %v360_v16 = vld [vmem:[%s3935_s1 + $0xa10] sm:$0xff] }
  0x6f   :  { %1769 = vmatprep.subr.bf16.mxu0 %v1768_v17  ;;  %1961 = vmatprep.subr.bf16.mxu1 %v1960_v21  ;;  %v1980_v17 = vpack.c.bf16 %v366_v10, %v361_v9  ;;  %v371_v21 = vld [vmem:[%s3935_s1 + $0xa68] sm:$0xff]  ;;  %v1790_v24 = vpack.c.bf16 %v363_v15, %v358_v14  ;;  %v1982_v25 = vpack.c.bf16 %v365_v18, %v360_v16  ;;  %v405_v9 = vld [vmem:[%s3935_s1 + $0xb78] sm:$0xff]  ;;  %v408_v18 = vld [vmem:[%s3935_s1 + $0xb90] sm:$0xff] }
  0x70   :  { %v1984_v30 = vpack.c.bf16 %v376_v22, %v371_v21  ;;  %v409_v10 = vld [vmem:[%s3935_s1 + $0xb98] sm:$0xff]  ;;  %v3215_v14 = vld [vmem:[%s3936_s0 + $0x28] sm:$0xff]  ;;  %v1998_v16 = vpack.c.bf16 %v405_v9, %v400_v7  ;;  %v448_v9 = vld [vmem:[%s3935_s1 + $0xcd0] sm:$0xff] }
  0x71   :  { %v415_v22 = vld [vmem:[%s3935_s1 + $0xbc8] sm:$0xff] }
  0x72   :  { %1771 = vmatpush1.bf16.msra.mxu0 %v1770_v27  ;;  %1963 = vmatpush1.bf16.msra.mxu1 %v1962_v28  ;;  %v368_v27 = vld [vmem:[%s3935_s1 + $0xa50] sm:$0xff]  ;;  %v373_v28 = vld [vmem:[%s3935_s1 + $0xa78] sm:$0xff] }
  0x73   :  { %1773 = vmatprep.subr.bf16.mxu0 %v1772_v29  ;;  %1965 = vmatprep.subr.bf16.mxu1 %v1964_v33  ;;  %v370_v29 = vld [vmem:[%s3935_s1 + $0xa60] sm:$0xff]  ;;  %v384_v33 = vld [vmem:[%s3935_s1 + $0xad0] sm:$0xff]  ;;  %v1794_v37 = vpack.c.bf16 %v373_v28, %v368_v27  ;;  %v1810_v28 = vpack.c.bf16 %v413_v19, %v408_v18 }
  0x74   :  { %v426_v27 = vld [vmem:[%s3935_s1 + $0xc20] sm:$0xff] }
  0x75   :  { %v466_v18 = vld [vmem:[%s3935_s1 + $0xd60] sm:$0xff] }
  0x76   :  { %1775 = vmatpush1.bf16.msra.mxu0 %v1774_v39  ;;  %1967 = vmatpush1.bf16.msra.mxu1 %v1966_v40  ;;  %v1986_v39 = vpack.c.bf16 %v375_v31, %v370_v29  ;;  %v1796_v40 = vpack.c.bf16 %v384_v33, %v379_v32  ;;  %v2002_v29 = vpack.c.bf16 %v415_v22, %v410_v20  ;;  %v418_v31 = vld [vmem:[%s3935_s1 + $0xbe0] sm:$0xff]  ;;  %v423_v32 = vld [vmem:[%s3935_s1 + $0xc08] sm:$0xff]  ;;  %v420_v33 = vld [vmem:[%s3935_s1 + $0xbf0] sm:$0xff] }
  0x77   :  { %1777 = vmatprep.subr.bf16.mxu0 %v1776_v41  ;;  %1969 = vmatprep.subr.bf16.mxu1 %v1968_v45  ;;  %v378_v41 = vld [vmem:[%s3935_s1 + $0xaa0] sm:$0xff]  ;;  %v385_v45 = vld [vmem:[%s3935_s1 + $0xad8] sm:$0xff] }
  0x78   :  { %v458_v22 = vld [vmem:[%s3935_s1 + $0xd20] sm:$0xff] }
  0x7a   :  { %1779 = vmatpush1.bf16.msra.mxu0 %v1778_v51  ;;  %1971 = vmatpush1.bf16.msra.mxu1 %v1970_v52  ;;  %v1798_v51 = vpack.c.bf16 %v383_v42, %v378_v41  ;;  %v3145_v52 = vld [vmem:[%s3936_s0 + $0x70] sm:$0xff]  ;;  %v1814_v42 = vpack.c.bf16 %v423_v32, %v418_v31 }
  0x7b   :  { %1781 = vmatprep.subr.bf16.mxu0 %v1780_v53  ;;  %1973 = vmatprep.subr.bf16.mxu1 %v1972_v57  ;;  %v1990_v53 = vpack.c.bf16 %v385_v45, %v380_v43  ;;  %v390_v57 = vld [vmem:[%s3935_s1 + $0xb00] sm:$0xff]  ;;  %v436_v41 = vld [vmem:[%s3935_s1 + $0xc70] sm:$0xff]  ;;  %v2006_v43 = vpack.c.bf16 %v425_v35, %v420_v33 }
  0x7c   :  { %v1994_v3 = vpack.c.bf16 %v395_v59, %v390_v57  ;;  %v428_v45 = vld [vmem:[%s3935_s1 + $0xc30] sm:$0xff]  ;;  %v2010_v57 = vpack.c.bf16 %v435_v49, %v430_v47  ;;  %v438_v59 = vld [vmem:[%s3935_s1 + $0xc80] sm:$0xff] }
  0x7d   :  { %v476_v31 = vld [vmem:[%s3935_s1 + $0xdb0] sm:$0xff]  ;;  %v478_v49 = vld [vmem:[%s3935_s1 + $0xdc0] sm:$0xff] }
  0x7e   :  { %1783 = vmatpush1.bf16.msra.mxu0 %v1782_v63  ;;  %1975 = vmatpush1.bf16.msra.mxu1 %v1974_v0  ;;  %v406_v63 = vld [vmem:[%s3935_s1 + $0xb80] sm:$0xff]  ;;  %v3177_v0 = vld [vmem:[%s3936_s0 + $0xa8] sm:$0xff]  ;;  %v468_v35 = vld [vmem:[%s3935_s1 + $0xd70] sm:$0xff] }
  0x7f   :  { %1785 = vmatprep.subr.bf16.mxu0 %v1784_v1  ;;  %1977 = vmatprep.subr.bf16.mxu1 %v1976_v5  ;;  %v1802_v1 = vpack.c.bf16 %v393_v56, %v388_v55  ;;  %v398_v5 = vld [vmem:[%s3935_s1 + $0xb40] sm:$0xff]  ;;  %v1996_v8 = vpack.c.bf16 %v406_v63, %v401_v62  ;;  %v1818_v56 = vpack.c.bf16 %v433_v46, %v428_v45  ;;  %v445_v63 = vld [vmem:[%s3935_s1 + $0xcb8] sm:$0xff] }
  0x80   :  { %v1806_v15 = vpack.c.bf16 %v403_v6, %v398_v5  ;;  %v446_v55 = vld [vmem:[%s3935_s1 + $0xcc0] sm:$0xff]  ;;  %v456_v5 = vld [vmem:[%s3935_s1 + $0xd10] sm:$0xff]  ;;  %v1822_v6 = vpack.c.bf16 %v443_v60, %v438_v59  ;;  %v2014_v7 = vpack.c.bf16 %v445_v63, %v440_v61 }
  0x81   :  { %v486_v45 = vld [vmem:[%s3935_s1 + $0xe00] sm:$0xff]  ;;  %v496_v59 = vld [vmem:[%s3935_s1 + $0xe50] sm:$0xff] }
  0x82   :  { %1787 = vmatpush1.bf16.msra.mxu0 %v1786_v11  ;;  %1979 = vmatpush1.bf16.msra.mxu1 %v1978_v12  ;;  %v414_v11 = vld [vmem:[%s3935_s1 + $0xbc0] sm:$0xff]  ;;  %v411_v12 = vld [vmem:[%s3935_s1 + $0xba8] sm:$0xff]  ;;  %v488_v63 = vld [vmem:[%s3935_s1 + $0xe10] sm:$0xff] }
  0x83   :  { %1789 = vmatprep.subr.bf16.mxu0 %v1788_v13  ;;  %1981 = vmatprep.subr.bf16.mxu1 %v1980_v17  ;;  %v416_v13 = vld [vmem:[%s3935_s1 + $0xbd0] sm:$0xff]  ;;  %v1808_v17 = vpack.c.bf16 %v414_v11, %v409_v10  ;;  %v453_v10 = vld [vmem:[%s3935_s1 + $0xcf8] sm:$0xff]  ;;  %v450_v11 = vld [vmem:[%s3935_s1 + $0xce0] sm:$0xff] }
  0x84   :  { %v2000_v21 = vpack.c.bf16 %v416_v13, %v411_v12  ;;  %v455_v13 = vld [vmem:[%s3935_s1 + $0xd08] sm:$0xff]  ;;  %v1826_v19 = vpack.c.bf16 %v453_v10, %v448_v9  ;;  %v506_v9 = vld [vmem:[%s3935_s1 + $0xea0] sm:$0xff] }
  0x85   :  { %721 = vmatmul.mubr.f32.vlgmr.msra.gmra.mrb[0].mxu0 %v3071_v23  ;;  %988 = vmatmul.mubr.f32.vlgmr.msra.gmra.mrb[0].mxu1 %v3071_v23  ;;  %v2018_v20 = vpack.c.bf16 %v455_v13, %v450_v11  ;;  %v498_v13 = vld [vmem:[%s3935_s1 + $0xe60] sm:$0xff] }
  0x86   :  { %1791 = vmatpush1.bf16.msra.mxu0 %v1790_v24  ;;  %1983 = vmatpush1.bf16.msra.mxu1 %v1982_v25  ;;  %v419_v24 = vld [vmem:[%s3935_s1 + $0xbe8] sm:$0xff]  ;;  %v424_v25 = vld [vmem:[%s3935_s1 + $0xc10] sm:$0xff] }
  0x87   :  { %1793 = vmatprep.subr.bf16.mxu0 %v1792_v26  ;;  %1985 = vmatprep.subr.bf16.mxu1 %v1984_v30  ;;  %v421_v26 = vld [vmem:[%s3935_s1 + $0xbf8] sm:$0xff]  ;;  %v1812_v30 = vpack.c.bf16 %v424_v25, %v419_v24  ;;  %v463_v24 = vld [vmem:[%s3935_s1 + $0xd48] sm:$0xff]  ;;  %v460_v25 = vld [vmem:[%s3935_s1 + $0xd30] sm:$0xff] }
  0x88   :  { %726 = vmatprep.mubr.f32.mxu0 %v3101_v36  ;;  %993 = vmatprep.mubr.f32.mxu1 %v3101_v36  ;;  %v2004_v34 = vpack.c.bf16 %v426_v27, %v421_v26  ;;  %v465_v27 = vld [vmem:[%s3935_s1 + $0xd58] sm:$0xff]  ;;  %v1830_v32 = vpack.c.bf16 %v463_v24, %v458_v22  ;;  %v516_v22 = vld [vmem:[%s3935_s1 + $0xef0] sm:$0xff] }
  0x89   :  { %727 = vmatmul.mubr.f32.gmra.mrb[2].mxu0 %v3107_v38  ;;  %994 = vmatmul.mubr.f32.gmra.mrb[2].mxu1 %v3107_v38  ;;  %v2022_v33 = vpack.c.bf16 %v465_v27, %v460_v25  ;;  %v508_v27 = vld [vmem:[%s3935_s1 + $0xeb0] sm:$0xff] }
  0x8a   :  { %1795 = vmatpush1.bf16.msra.mxu0 %v1794_v37  ;;  %1987 = vmatpush1.bf16.msra.mxu1 %v1986_v39  ;;  %v429_v37 = vld [vmem:[%s3935_s1 + $0xc38] sm:$0xff]  ;;  %v434_v39 = vld [vmem:[%s3935_s1 + $0xc60] sm:$0xff] }
  0x8b   :  { %1797 = vmatprep.subr.bf16.mxu0 %v1796_v40  ;;  %1989 = vmatprep.subr.bf16.mxu1 %v1988_v44  ;;  %v431_v40 = vld [vmem:[%s3935_s1 + $0xc48] sm:$0xff]  ;;  %v1816_v44 = vpack.c.bf16 %v434_v39, %v429_v37  ;;  %v473_v37 = vld [vmem:[%s3935_s1 + $0xd98] sm:$0xff]  ;;  %v470_v39 = vld [vmem:[%s3935_s1 + $0xd80] sm:$0xff] }
  0x8c   :  { %732 = vmatprep.mubr.f32.mxu0 %v3139_v50  ;;  %999 = vmatprep.mubr.f32.mxu1 %v3139_v50  ;;  %v2008_v48 = vpack.c.bf16 %v436_v41, %v431_v40  ;;  %v475_v41 = vld [vmem:[%s3935_s1 + $0xda8] sm:$0xff]  ;;  %v1834_v46 = vpack.c.bf16 %v473_v37, %v468_v35 }
  0x8d   :  { %733 = vmatmul.mubr.f32.gmra.mrb[4].mxu0 %v3145_v52  ;;  %1000 = vmatmul.mubr.f32.gmra.mrb[4].mxu1 %v3145_v52  ;;  %v2026_v47 = vpack.c.bf16 %v475_v41, %v470_v39  ;;  %v287_v35 = vld [vmem:[%s3935_s1 + $0x7c8] sm:$0xff]  ;;  %v42_v41 = vld [vmem:[%s3935_s1 + $0x20] sm:$0xff] }
  0x8e   :  { %1799 = vmatpush1.bf16.msra.mxu0 %v1798_v51  ;;  %1991 = vmatpush1.bf16.msra.mxu1 %v1990_v53  ;;  %v439_v51 = vld [vmem:[%s3935_s1 + $0xc88] sm:$0xff]  ;;  %v444_v53 = vld [vmem:[%s3935_s1 + $0xcb0] sm:$0xff] }
  0x8f   :  { %1801 = vmatprep.subr.bf16.mxu0 %v1800_v54  ;;  %1993 = vmatprep.subr.bf16.mxu1 %v1992_v58  ;;  %v441_v54 = vld [vmem:[%s3935_s1 + $0xc98] sm:$0xff]  ;;  %v1820_v58 = vpack.c.bf16 %v444_v53, %v439_v51  ;;  %v483_v51 = vld [vmem:[%s3935_s1 + $0xde8] sm:$0xff]  ;;  %v480_v53 = vld [vmem:[%s3935_s1 + $0xdd0] sm:$0xff] }
  0x90   :  { %738 = vmatprep.mubr.f32.mxu0 %v3177_v0  ;;  %1005 = vmatprep.mubr.f32.mxu1 %v3177_v0  ;;  %v2012_v62 = vpack.c.bf16 %v446_v55, %v441_v54  ;;  %v485_v55 = vld [vmem:[%s3935_s1 + $0xdf8] sm:$0xff]  ;;  %v1838_v60 = vpack.c.bf16 %v483_v51, %v478_v49  ;;  %v292_v51 = vld [vmem:[%s3935_s1 + $0x7f0] sm:$0xff] }
  0x91   :  { %739 = vmatmul.mubr.f32.gmra.mrb[6].mxu0 %v3183_v2  ;;  %1006 = vmatmul.mubr.f32.gmra.mrb[6].mxu1 %v3183_v2  ;;  %v2030_v61 = vpack.c.bf16 %v485_v55, %v480_v53  ;;  %v297_v53 = vld [vmem:[%s3935_s1 + $0x818] sm:$0xff]  ;;  %v52_v55 = vld [vmem:[%s3935_s1 + $0x70] sm:$0xff] }
  0x92   :  { %1803 = vmatpush1.bf16.msra.mxu0 %v1802_v1  ;;  %1995 = vmatpush1.bf16.msra.mxu1 %v1994_v3  ;;  %v449_v1 = vld [vmem:[%s3935_s1 + $0xcd8] sm:$0xff]  ;;  %v454_v3 = vld [vmem:[%s3935_s1 + $0xd00] sm:$0xff] }
  0x93   :  { %1805 = vmatprep.subr.bf16.mxu0 %v1804_v4  ;;  %1997 = vmatprep.subr.bf16.mxu1 %v1996_v8  ;;  %v451_v4 = vld [vmem:[%s3935_s1 + $0xce8] sm:$0xff]  ;;  %v1824_v8 = vpack.c.bf16 %v454_v3, %v449_v1  ;;  %v493_v1 = vld [vmem:[%s3935_s1 + $0xe38] sm:$0xff]  ;;  %v490_v3 = vld [vmem:[%s3935_s1 + $0xe20] sm:$0xff] }
  0x94   :  { %809 = vmatprep.mubr.f32.mxu0 %v3215_v14  ;;  %1076 = vmatprep.mubr.f32.mxu1 %v3215_v14  ;;  %v2016_v12 = vpack.c.bf16 %v456_v5, %v451_v4  ;;  %v495_v5 = vld [vmem:[%s3935_s1 + $0xe48] sm:$0xff]  ;;  %v1842_v10 = vpack.c.bf16 %v493_v1, %v488_v63  ;;  %v3541_v1 = vld [vmem:[%s3936_s0 + $0x50] sm:$0xff] }
  0x95   :  { %v2034_v11 = vpack.c.bf16 %v495_v5, %v490_v3  ;;  %v147_v63 = vld [vmem:[%s3935_s1 + $0x368] sm:$0xff] }
  0x96   :  { %1807 = vmatpush1.bf16.msra.mxu0 %v1806_v15  ;;  %1999 = vmatpush1.bf16.msra.mxu1 %v1998_v16  ;;  %v459_v15 = vld [vmem:[%s3935_s1 + $0xd28] sm:$0xff]  ;;  %v464_v16 = vld [vmem:[%s3935_s1 + $0xd50] sm:$0xff] }
  0x97   :  { %1809 = vmatprep.subr.bf16.mxu0 %v1808_v17  ;;  %2001 = vmatprep.subr.bf16.mxu1 %v2000_v21  ;;  %v461_v17 = vld [vmem:[%s3935_s1 + $0xd38] sm:$0xff]  ;;  %v1828_v21 = vpack.c.bf16 %v464_v16, %v459_v15  ;;  %v503_v15 = vld [vmem:[%s3935_s1 + $0xe88] sm:$0xff]  ;;  %v500_v16 = vld [vmem:[%s3935_s1 + $0xe70] sm:$0xff] }
  0x98   :  { %v2020_v26 = vpack.c.bf16 %v466_v18, %v461_v17  ;;  %v505_v18 = vld [vmem:[%s3935_s1 + $0xe98] sm:$0xff]  ;;  %v1846_v24 = vpack.c.bf16 %v503_v15, %v498_v13  ;;  %v307_v5 = vld [vmem:[%s3935_s1 + $0x868] sm:$0xff]  ;;  %v3572_v13 = vld [vmem:[%s3936_s0 + $0x80] sm:$0xff] }
  0x99   :  { %v2038_v25 = vpack.c.bf16 %v505_v18, %v500_v16  ;;  %v152_v16 = vld [vmem:[%s3935_s1 + $0x390] sm:$0xff] }
  0x9a   :  { %1811 = vmatpush1.bf16.msra.mxu0 %v1810_v28  ;;  %2003 = vmatpush1.bf16.msra.mxu1 %v2002_v29  ;;  %v469_v28 = vld [vmem:[%s3935_s1 + $0xd78] sm:$0xff]  ;;  %v474_v29 = vld [vmem:[%s3935_s1 + $0xda0] sm:$0xff] }
  0x9b   :  { %1813 = vmatprep.subr.bf16.mxu0 %v1812_v30  ;;  %2005 = vmatprep.subr.bf16.mxu1 %v2004_v34  ;;  %v471_v30 = vld [vmem:[%s3935_s1 + $0xd88] sm:$0xff]  ;;  %v1832_v34 = vpack.c.bf16 %v474_v29, %v469_v28  ;;  %v513_v28 = vld [vmem:[%s3935_s1 + $0xed8] sm:$0xff]  ;;  %v510_v29 = vld [vmem:[%s3935_s1 + $0xec0] sm:$0xff] }
  0x9c   :  { %v2024_v40 = vpack.c.bf16 %v476_v31, %v471_v30  ;;  %v515_v31 = vld [vmem:[%s3935_s1 + $0xee8] sm:$0xff]  ;;  %v1850_v37 = vpack.c.bf16 %v513_v28, %v508_v27  ;;  %v237_v28 = vld [vmem:[%s3935_s1 + $0x638] sm:$0xff] }
  0x9d   :  { %v2042_v39 = vpack.c.bf16 %v515_v31, %v510_v29  ;;  %v162_v29 = vld [vmem:[%s3935_s1 + $0x3e0] sm:$0xff] }
  0x9e   :  { %1815 = vmatpush1.bf16.msra.mxu0 %v1814_v42  ;;  %2007 = vmatpush1.bf16.msra.mxu1 %v2006_v43  ;;  %v479_v42 = vld [vmem:[%s3935_s1 + $0xdc8] sm:$0xff]  ;;  %v484_v43 = vld [vmem:[%s3935_s1 + $0xdf0] sm:$0xff] }
  0x9f   :  { %1817 = vmatprep.subr.bf16.mxu0 %v1816_v44  ;;  %2009 = vmatprep.subr.bf16.mxu1 %v2008_v48  ;;  %v481_v44 = vld [vmem:[%s3935_s1 + $0xdd8] sm:$0xff]  ;;  %v1836_v48 = vpack.c.bf16 %v484_v43, %v479_v42  ;;  %v47_v42 = vld [vmem:[%s3935_s1 + $0x48] sm:$0xff] }
  0xa0   :  { %v2028_v54 = vpack.c.bf16 %v486_v45, %v481_v44  ;;  %v202_v44 = vld [vmem:[%s3935_s1 + $0x520] sm:$0xff]  ;;  %v207_v45 = vld [vmem:[%s3935_s1 + $0x548] sm:$0xff]  ;;  %v2046_v49 = vpack.c.bf16 %v47_v42, %v42_v41 }
  0xa1   :  { %v87_v41 = vld [vmem:[%s3935_s1 + $0x188] sm:$0xff]  ;;  %v242_v42 = vld [vmem:[%s3935_s1 + $0x660] sm:$0xff] }
  0xa2   :  { %1819 = vmatpush1.bf16.msra.mxu0 %v1818_v56  ;;  %2011 = vmatpush1.bf16.msra.mxu1 %v2010_v57  ;;  %v489_v56 = vld [vmem:[%s3935_s1 + $0xe18] sm:$0xff]  ;;  %v494_v57 = vld [vmem:[%s3935_s1 + $0xe40] sm:$0xff] }
  0xa3   :  { %1821 = vmatprep.subr.bf16.mxu0 %v1820_v58  ;;  %2013 = vmatprep.subr.bf16.mxu1 %v2012_v62  ;;  %v491_v58 = vld [vmem:[%s3935_s1 + $0xe28] sm:$0xff]  ;;  %v1840_v62 = vpack.c.bf16 %v494_v57, %v489_v56  ;;  %v57_v56 = vld [vmem:[%s3935_s1 + $0x98] sm:$0xff] }
  0xa4   :  { %v2032_v4 = vpack.c.bf16 %v496_v59, %v491_v58  ;;  %v3522_v57 = vld [vmem:[%s3936_s0 + $0x58] sm:$0xff]  ;;  %v212_v59 = vld [vmem:[%s3935_s1 + $0x570] sm:$0xff]  ;;  %v2050_v3 = vpack.c.bf16 %v57_v56, %v52_v55 }
  0xa5   :  { %v92_v55 = vld [vmem:[%s3935_s1 + $0x1b0] sm:$0xff]  ;;  %v97_v56 = vld [vmem:[%s3935_s1 + $0x1d8] sm:$0xff] }
  0xa6   :  { %1823 = vmatpush1.bf16.msra.mxu0 %v1822_v6  ;;  %2015 = vmatpush1.bf16.msra.mxu1 %v2014_v7  ;;  %v499_v6 = vld [vmem:[%s3935_s1 + $0xe68] sm:$0xff]  ;;  %v504_v7 = vld [vmem:[%s3935_s1 + $0xe90] sm:$0xff] }
  0xa7   :  { %1825 = vmatprep.subr.bf16.mxu0 %v1824_v8  ;;  %2017 = vmatprep.subr.bf16.mxu1 %v2016_v12  ;;  %v501_v8 = vld [vmem:[%s3935_s1 + $0xe78] sm:$0xff]  ;;  %v1844_v12 = vpack.c.bf16 %v504_v7, %v499_v6  ;;  %v62_v7 = vld [vmem:[%s3935_s1 + $0xc0] sm:$0xff] }
  0xa8   :  { %v2036_v17 = vpack.c.bf16 %v506_v9, %v501_v8  ;;  %v67_v8 = vld [vmem:[%s3935_s1 + $0xe8] sm:$0xff] }
  0xa9   :  { %v3560_v9 = vld [vmem:[%s3936_s0 + $0x88] sm:$0xff]  ;;  %v2054_v18 = vpack.c.bf16 %v67_v8, %v62_v7 }
  0xaa   :  { %1827 = vmatpush1.bf16.msra.mxu0 %v1826_v19  ;;  %2019 = vmatpush1.bf16.msra.mxu1 %v2018_v20  ;;  %v509_v19 = vld [vmem:[%s3935_s1 + $0xeb8] sm:$0xff]  ;;  %v514_v20 = vld [vmem:[%s3935_s1 + $0xee0] sm:$0xff] }
  0xab   :  { %1829 = vmatprep.subr.bf16.mxu0 %v1828_v21  ;;  %2021 = vmatprep.subr.bf16.mxu1 %v2020_v26  ;;  %v511_v21 = vld [vmem:[%s3935_s1 + $0xec8] sm:$0xff]  ;;  %v1848_v26 = vpack.c.bf16 %v514_v20, %v509_v19  ;;  %v3584_v19 = vld [vmem:[%s3936_s0 + $0xb8] sm:$0xff]  ;;  %v312_v20 = vld [vmem:[%s3935_s1 + $0x890] sm:$0xff] }
  0xac   :  { %v2040_v30 = vpack.c.bf16 %v516_v22, %v511_v21  ;;  %v317_v21 = vld [vmem:[%s3935_s1 + $0x8b8] sm:$0xff] }
  0xad   :  { %v2088_v31 = vpack.c.bf16 %v317_v21, %v312_v20  ;;  %v352_v20 = vld [vmem:[%s3935_s1 + $0x9d0] sm:$0xff]  ;;  %v357_v21 = vld [vmem:[%s3935_s1 + $0x9f8] sm:$0xff] }
  0xae   :  { %1831 = vmatpush1.bf16.msra.mxu0 %v1830_v32  ;;  %2023 = vmatpush1.bf16.msra.mxu1 %v2022_v33  ;;  %v122_v32 = vld [vmem:[%s3935_s1 + $0x2a0] sm:$0xff]  ;;  %v127_v33 = vld [vmem:[%s3935_s1 + $0x2c8] sm:$0xff] }
  0xaf   :  { %1833 = vmatprep.subr.bf16.mxu0 %v1832_v34  ;;  %2025 = vmatprep.subr.bf16.mxu1 %v2024_v40  ;;  %v282_v34 = vld [vmem:[%s3935_s1 + $0x7a0] sm:$0xff]  ;;  %v2044_v40 = vpack.c.bf16 %v127_v33, %v122_v32  ;;  %v327_v33 = vld [vmem:[%s3935_s1 + $0x908] sm:$0xff] }
  0xb0   :  { %v2076_v43 = vpack.c.bf16 %v287_v35, %v282_v34  ;;  %v322_v32 = vld [vmem:[%s3935_s1 + $0x8e0] sm:$0xff]  ;;  %v3623_v34 = vld [vmem:[%s3936_s0 + $0xb0] sm:$0xff] }
  0xb2   :  { %1835 = vmatpush1.bf16.msra.mxu0 %v1834_v46  ;;  %2027 = vmatpush1.bf16.msra.mxu1 %v2026_v47  ;;  %v132_v46 = vld [vmem:[%s3935_s1 + $0x2f0] sm:$0xff]  ;;  %v137_v47 = vld [vmem:[%s3935_s1 + $0x318] sm:$0xff] }
  0xb3   :  { %1837 = vmatprep.subr.bf16.mxu0 %v1836_v48  ;;  %2029 = vmatprep.subr.bf16.mxu1 %v2028_v54  ;;  %v3505_v48 = vld [vmem:[%s3936_s0 + $0x20] sm:$0xff]  ;;  %v2078_v54 = vpack.c.bf16 %v207_v45, %v202_v44  ;;  %v2048_v58 = vpack.c.bf16 %v137_v47, %v132_v46  ;;  %v247_v44 = vld [vmem:[%s3935_s1 + $0x688] sm:$0xff]  ;;  %v172_v45 = vld [vmem:[%s3935_s1 + $0x430] sm:$0xff] }
  0xb4   :  { %v177_v46 = vld [vmem:[%s3935_s1 + $0x458] sm:$0xff]  ;;  %v332_v47 = vld [vmem:[%s3935_s1 + $0x930] sm:$0xff] }
  0xb6   :  { %1839 = vmatpush1.bf16.msra.mxu0 %v1838_v60  ;;  %2031 = vmatpush1.bf16.msra.mxu1 %v2030_v61  ;;  %v217_v60 = vld [vmem:[%s3935_s1 + $0x598] sm:$0xff]  ;;  %v2080_v61 = vpack.c.bf16 %v297_v53, %v292_v51  ;;  %v2094_v53 = vpack.c.bf16 %v247_v44, %v242_v42 }
  0xb7   :  { %1841 = vmatprep.subr.bf16.mxu0 %v1840_v62  ;;  %2033 = vmatprep.subr.bf16.mxu1 %v2032_v4  ;;  %v142_v62 = vld [vmem:[%s3935_s1 + $0x340] sm:$0xff]  ;;  %v2082_v6 = vpack.c.bf16 %v217_v60, %v212_v59  ;;  %v257_v60 = vld [vmem:[%s3935_s1 + $0x6d8] sm:$0xff] }
  0xb8   :  { %v302_v4 = vld [vmem:[%s3935_s1 + $0x840] sm:$0xff]  ;;  %v457_v42 = vld [vmem:[%s3935_s1 + $0xd18] sm:$0xff] }
  0xb9   :  { %v2084_v15 = vpack.c.bf16 %v307_v5, %v302_v4  ;;  %v347_v4 = vld [vmem:[%s3935_s1 + $0x9a8] sm:$0xff]  ;;  %v2209_v5 = vld [vmem:[%s3936_s0 + $0x18] sm:$0xff] }
  0xba   :  { %1843 = vmatpush1.bf16.msra.mxu0 %v1842_v10  ;;  %2035 = vmatpush1.bf16.msra.mxu1 %v2034_v11  ;;  %v2052_v10 = vpack.c.bf16 %v147_v63, %v142_v62  ;;  %v222_v11 = vld [vmem:[%s3935_s1 + $0x5c0] sm:$0xff]  ;;  %v187_v62 = vld [vmem:[%s3935_s1 + $0x4a8] sm:$0xff] }
  0xbb   :  { %1845 = vmatprep.subr.bf16.mxu0 %v1844_v12  ;;  %2037 = vmatprep.subr.bf16.mxu1 %v2036_v17  ;;  %v227_v12 = vld [vmem:[%s3935_s1 + $0x5e8] sm:$0xff]  ;;  %v157_v17 = vld [vmem:[%s3935_s1 + $0x3b8] sm:$0xff] }
  0xbc   :  { %v2086_v22 = vpack.c.bf16 %v227_v12, %v222_v11  ;;  %v2056_v27 = vpack.c.bf16 %v157_v17, %v152_v16  ;;  %v2208_v63 = vld [vmem:[%s3936_s0 + $0x8] sm:$0xff]  ;;  %v262_v12 = vld [vmem:[%s3935_s1 + $0x700] sm:$0xff]  ;;  %v192_v17 = vld [vmem:[%s3935_s1 + $0x4d0] sm:$0xff] }
  0xbd   :  { %v107_v11 = vld [vmem:[%s3935_s1 + $0x228] sm:$0xff] }
  0xbe   :  { %1847 = vmatpush1.bf16.msra.mxu0 %v1846_v24  ;;  %2039 = vmatpush1.bf16.msra.mxu1 %v2038_v25  ;;  %v72_v24 = vld [vmem:[%s3935_s1 + $0x110] sm:$0xff]  ;;  %v77_v25 = vld [vmem:[%s3935_s1 + $0x138] sm:$0xff]  ;;  %v267_v16 = vld [vmem:[%s3935_s1 + $0x728] sm:$0xff] }
  0xbf   :  { %1849 = vmatprep.subr.bf16.mxu0 %v1848_v26  ;;  %2041 = vmatprep.subr.bf16.mxu1 %v2040_v30  ;;  %v232_v26 = vld [vmem:[%s3935_s1 + $0x610] sm:$0xff]  ;;  %v167_v30 = vld [vmem:[%s3935_s1 + $0x408] sm:$0xff]  ;;  %v2058_v35 = vpack.c.bf16 %v77_v25, %v72_v24  ;;  %v2102_v24 = vpack.c.bf16 %v267_v16, %v262_v12 }
  0xc0   :  { %v2216_v12 = vld [vmem:[%s3936_s0 + $0x90] sm:$0xff] }
  0xc2   :  { %1851 = vmatpush1.bf16.msra.mxu0 %v1850_v37  ;;  %2043 = vmatpush1.bf16.msra.mxu1 %v2042_v39  ;;  %v2090_v37 = vpack.c.bf16 %v237_v28, %v232_v26  ;;  %v2060_v39 = vpack.c.bf16 %v167_v30, %v162_v29  ;;  %v112_v26 = vld [vmem:[%s3935_s1 + $0x250] sm:$0xff]  ;;  %v2104_v29 = vpack.c.bf16 %v357_v21, %v352_v20  ;;  %v277_v30 = vld [vmem:[%s3935_s1 + $0x778] sm:$0xff] }
  0xc3   :  { %2045 = vmatprep.subr.bf16.mxu0 %v2044_v40  ;;  %2077 = vmatprep.subr.bf16.mxu1 %v2076_v43  ;;  %v82_v40 = vld [vmem:[%s3935_s1 + $0x160] sm:$0xff]  ;;  %v2092_v43 = vpack.c.bf16 %v327_v33, %v322_v32  ;;  %v272_v28 = vld [vmem:[%s3935_s1 + $0x750] sm:$0xff]  ;;  %v447_v32 = vld [vmem:[%s3935_s1 + $0xcc8] sm:$0xff] }
  0xc4   :  { %v2062_v51 = vpack.c.bf16 %v87_v41, %v82_v40  ;;  %v367_v40 = vld [vmem:[%s3935_s1 + $0xa48] sm:$0xff]  ;;  %v452_v41 = vld [vmem:[%s3935_s1 + $0xcf0] sm:$0xff] }
  0xc5   :  { %810 = vmatmul.mubr.f32.vlgmr.msra.gmra.mrb[0].mxu0 %v3505_v48  ;;  %1077 = vmatmul.mubr.f32.vlgmr.msra.gmra.mrb[0].mxu1 %v3505_v48  ;;  %v2112_v44 = vpack.c.bf16 %v457_v42, %v452_v41 }
  0xc6   :  { %2047 = vmatpush3.bf16.msra.mxu0 %v2046_v49  ;;  %2079 = vmatpush3.bf16.msra.mxu1 %v2078_v54  ;;  %v337_v49 = vld [vmem:[%s3935_s1 + $0x958] sm:$0xff]  ;;  %v2064_v54 = vpack.c.bf16 %v177_v46, %v172_v45  ;;  %v372_v45 = vld [vmem:[%s3935_s1 + $0xa70] sm:$0xff] }
  0xc7   :  { %815 = vmatprep.mubr.f32.mxu0 %v3522_v57  ;;  %1082 = vmatprep.mubr.f32.mxu1 %v3522_v57  ;;  %v2096_v59 = vpack.c.bf16 %v337_v49, %v332_v47  ;;  %v377_v46 = vld [vmem:[%s3935_s1 + $0xa98] sm:$0xff]  ;;  %v462_v47 = vld [vmem:[%s3935_s1 + $0xd40] sm:$0xff]  ;;  %v467_v49 = vld [vmem:[%s3935_s1 + $0xd68] sm:$0xff] }
  0xc8   :  { %2049 = vmatprep.subr.bf16.mxu0 %v2048_v58  ;;  %2081 = vmatprep.subr.bf16.mxu1 %v2080_v61  ;;  %v252_v58 = vld [vmem:[%s3935_s1 + $0x6b0] sm:$0xff]  ;;  %v182_v61 = vld [vmem:[%s3935_s1 + $0x480] sm:$0xff] }
  0xc9   :  { %816 = vmatmul.mubr.f32.gmra.mrb[2].mxu0 %v3541_v1  ;;  %1083 = vmatmul.mubr.f32.gmra.mrb[2].mxu1 %v3541_v1  ;;  %v2098_v7 = vpack.c.bf16 %v257_v60, %v252_v58  ;;  %v2068_v8 = vpack.c.bf16 %v187_v62, %v182_v61  ;;  %v472_v58 = vld [vmem:[%s3935_s1 + $0xd90] sm:$0xff] }
  0xca   :  { %2051 = vmatpush3.bf16.msra.mxu0 %v2050_v3  ;;  %2083 = vmatpush3.bf16.msra.mxu1 %v2082_v6  ;;  %v342_v3 = vld [vmem:[%s3935_s1 + $0x980] sm:$0xff]  ;;  %v2066_v6 = vpack.c.bf16 %v97_v56, %v92_v55  ;;  %v387_v56 = vld [vmem:[%s3935_s1 + $0xae8] sm:$0xff]  ;;  %v2212_v60 = vld [vmem:[%s3936_s0 + $0x30] sm:$0xff] }
  0xcb   :  { %821 = vmatprep.mubr.f32.mxu0 %v3560_v9  ;;  %1088 = vmatprep.mubr.f32.mxu1 %v3560_v9  ;;  %v382_v55 = vld [vmem:[%s3935_s1 + $0xac0] sm:$0xff] }
  0xcc   :  { %2053 = vmatprep.subr.bf16.mxu0 %v2052_v10  ;;  %2085 = vmatprep.subr.bf16.mxu1 %v2084_v15  ;;  %v102_v10 = vld [vmem:[%s3935_s1 + $0x200] sm:$0xff]  ;;  %v2100_v15 = vpack.c.bf16 %v347_v4, %v342_v3  ;;  %v2118_v61 = vpack.c.bf16 %v387_v56, %v382_v55  ;;  %v397_v3 = vld [vmem:[%s3935_s1 + $0xb38] sm:$0xff]  ;;  %v2213_v4 = vld [vmem:[%s3936_s0 + $0x68] sm:$0xff] }
  0xcd   :  { %822 = vmatmul.mubr.f32.gmra.mrb[4].mxu0 %v3572_v13  ;;  %1089 = vmatmul.mubr.f32.gmra.mrb[4].mxu1 %v3572_v13 }
  0xce   :  { %2055 = vmatpush3.bf16.msra.mxu0 %v2054_v18  ;;  %2087 = vmatpush3.bf16.msra.mxu1 %v2086_v22  ;;  %v197_v18 = vld [vmem:[%s3935_s1 + $0x4f8] sm:$0xff]  ;;  %v2070_v22 = vpack.c.bf16 %v107_v11, %v102_v10  ;;  %v407_v10 = vld [vmem:[%s3935_s1 + $0xb88] sm:$0xff] }
  0xcf   :  { %827 = vmatprep.mubr.f32.mxu0 %v3584_v19  ;;  %1094 = vmatprep.mubr.f32.mxu1 %v3584_v19  ;;  %v2072_v25 = vpack.c.bf16 %v197_v18, %v192_v17  ;;  %v2215_v11 = vld [vmem:[%s3936_s0 + $0x98] sm:$0xff]  ;;  %v412_v17 = vld [vmem:[%s3935_s1 + $0xbb0] sm:$0xff] }
  0xd0   :  { %2057 = vmatprep.subr.bf16.mxu0 %v2056_v27  ;;  %2089 = vmatprep.subr.bf16.mxu1 %v2088_v31  ;;  %v117_v27 = vld [vmem:[%s3935_s1 + $0x278] sm:$0xff]  ;;  %v442_v31 = vld [vmem:[%s3935_s1 + $0xca0] sm:$0xff] }
  0xd1   :  { %828 = vmatmul.mubr.f32.gmra.mrb[6].mxu0 %v3623_v34  ;;  %1095 = vmatmul.mubr.f32.gmra.mrb[6].mxu1 %v3623_v34  ;;  %v2074_v33 = vpack.c.bf16 %v117_v27, %v112_v26  ;;  %v417_v18 = vld [vmem:[%s3935_s1 + $0xbd8] sm:$0xff]  ;;  %v432_v27 = vld [vmem:[%s3935_s1 + $0xc50] sm:$0xff] }
  0xd2   :  { %2059 = vmatpush3.bf16.msra.mxu0 %v2058_v35  ;;  %2091 = vmatpush3.bf16.msra.mxu1 %v2090_v37  ;;  %v2106_v35 = vpack.c.bf16 %v277_v30, %v272_v28  ;;  %v2108_v37 = vpack.c.bf16 %v447_v32, %v442_v31  ;;  %v2130_v20 = vpack.c.bf16 %v417_v18, %v412_v17  ;;  %v437_v28 = vld [vmem:[%s3935_s1 + $0xc78] sm:$0xff]  ;;  %v522_v30 = vlaneseq }
  0xd3   :  { %2061 = vmatprep.subr.bf16.mxu0 %v2060_v39  ;;  %2093 = vmatprep.subr.bf16.mxu1 %v2092_v43  ;;  %v362_v39 = vld [vmem:[%s3935_s1 + $0xa20] sm:$0xff] }
  0xd4   :  { %1165 = vmatprep.mubr.f32.mxu0 %v2208_v63  ;;  %1250 = vmatprep.mubr.f32.mxu1 %v2209_v5  ;;  %v2110_v43 = vpack.c.bf16 %v367_v40, %v362_v39  ;;  %v392_v63 = vld [vmem:[%s3935_s1 + $0xb10] sm:$0xff]  ;;  %v2214_v5 = vld [vmem:[%s3936_s0 + $0x60] sm:$0xff]  ;;  %v3851_v31 = vshrl.u32 %v522_v30, 7 }
  0xd6   :  { %2063 = vmatpush3.bf16.msra.mxu0 %v2062_v51  ;;  %2095 = vmatpush3.bf16.msra.mxu1 %v2094_v53  ;;  %v2210_v51 = vld [vmem:[%s3936_s0] sm:$0xff]  ;;  %v2114_v53 = vpack.c.bf16 %v377_v46, %v372_v45  ;;  %v1489_v32 = vsub.s32 3, %v3851_v31 }
  0xd7   :  { %2065 = vmatprep.subr.bf16.mxu0 %v2064_v54  ;;  %2097 = vmatprep.subr.bf16.mxu1 %v2096_v59  ;;  %v2116_v54 = vpack.c.bf16 %v467_v49, %v462_v47  ;;  %v2211_v59 = vld [vmem:[%s3936_s0 + $0x38] sm:$0xff]  ;;  %v3881_v49 = vadd.s32 8, %v3851_v31 }
  0xd9   :  { %vm1380_vm1 = vcmp.lt.s32.totalorder %v3881_v49, 15  ;;  %vm1422_vm2 = vcmp.lt.s32.totalorder %v3881_v49, 13  ;;  %vm1400_vm3 = vcmp.lt.s32.totalorder %v3881_v49, 14  ;;  %vm1444_vm4 = vcmp.lt.s32.totalorder %v3881_v49, 12 }
  0xda   :  { %2067 = vmatpush3.bf16.msra.mxu0 %v2066_v6  ;;  %2099 = vmatpush3.bf16.msra.mxu1 %v2098_v7  ;;  %v2122_v6 = vpack.c.bf16 %v397_v3, %v392_v63  ;;  %vm1466_vm5 = vcmp.lt.s32.totalorder %v3881_v49, 11 }
  0xdb   :  { %2069 = vmatprep.subr.bf16.mxu0 %v2068_v8  ;;  %2101 = vmatprep.subr.bf16.mxu1 %v2100_v15  ;;  %v402_v8 = vld [vmem:[%s3935_s1 + $0xb60] sm:$0xff] }
  0xdc   :  { %v2126_v15 = vpack.c.bf16 %v407_v10, %v402_v8 }
  0xde   :  { %2071 = vmatpush3.bf16.msra.mxu0 %v2070_v22  ;;  %2103 = vmatpush3.bf16.msra.mxu1 %v2102_v24  ;;  %v422_v22 = vld [vmem:[%s3935_s1 + $0xc00] sm:$0xff]  ;;  %v427_v24 = vld [vmem:[%s3935_s1 + $0xc28] sm:$0xff] }
  0xdf   :  { %2073 = vmatprep.subr.bf16.mxu0 %v2072_v25  ;;  %2105 = vmatprep.subr.bf16.mxu1 %v2104_v29  ;;  %v2134_v25 = vpack.c.bf16 %v427_v24, %v422_v22  ;;  %v2138_v29 = vpack.c.bf16 %v437_v28, %v432_v27 }
  0xe2   :  { %2075 = vmatpush3.bf16.msra.mxu0 %v2074_v33  ;;  %2107 = vmatpush3.bf16.msra.mxu1 %v2106_v35  ;;  %v3857_v33 = vld [vmem:[%s3937_s2] sm:$0xff] }
  0xe3   :  { %2109 = vmatprep.subr.bf16.mxu0 %v2108_v37  ;;  %2140 = vmatprep.subr.bf16.mxu1 %v2108_v37 }
  0xe5   :  { %1166 = vmatmul.mubr.f32.vlgmr.msra.gmra.mrb[8].mxu0 %v2210_v51  ;;  %1251 = vmatmul.mubr.f32.vlgmr.msra.gmra.mrb[8].mxu1 %v3071_v23  ;;  %v477_v23 = vld [vmem:[%s3935_s1 + $0xdb8] sm:$0xff] }
  0xe6   :  { %2111 = vmatpush3.bf16.msra.mxu0 %v2110_v43  ;;  %2148 = vmatpush3.bf16.msra.mxu1 %v2110_v43  ;;  %v2120_v62 = vpack.c.bf16 %v477_v23, %v472_v58 }
  0xe7   :  { %2113 = vmatprep.subr.bf16.mxu0 %v2112_v44  ;;  %2141 = vmatprep.subr.bf16.mxu1 %v2112_v44 }
  0xe8   :  { %1170 = vmatprep.mubr.f32.mxu0 %v2211_v59  ;;  %1255 = vmatprep.mubr.f32.mxu1 %v3101_v36  ;;  %v482_v36 = vld [vmem:[%s3935_s1 + $0xde0] sm:$0xff] }
  0xe9   :  { %1171 = vmatmul.mubr.f32.gmra.mrb[10].mxu0 %v2212_v60  ;;  %1256 = vmatmul.mubr.f32.gmra.mrb[10].mxu1 %v3107_v38  ;;  %v487_v38 = vld [vmem:[%s3935_s1 + $0xe08] sm:$0xff] }
  0xea   :  { %2115 = vmatpush3.bf16.msra.mxu0 %v2114_v53  ;;  %2149 = vmatpush3.bf16.msra.mxu1 %v2114_v53  ;;  %v2124_v7 = vpack.c.bf16 %v487_v38, %v482_v36 }
  0xeb   :  { %2117 = vmatprep.subr.bf16.mxu0 %v2116_v54  ;;  %2142 = vmatprep.subr.bf16.mxu1 %v2116_v54 }
  0xec   :  { %1175 = vmatprep.mubr.f32.mxu0 %v2213_v4  ;;  %1260 = vmatprep.mubr.f32.mxu1 %v3139_v50  ;;  %v492_v50 = vld [vmem:[%s3935_s1 + $0xe30] sm:$0xff] }
  0xed   :  { %1176 = vmatmul.mubr.f32.gmra.mrb[12].mxu0 %v2214_v5  ;;  %1261 = vmatmul.mubr.f32.gmra.mrb[12].mxu1 %v3145_v52  ;;  %v497_v52 = vld [vmem:[%s3935_s1 + $0xe58] sm:$0xff] }
  0xee   :  { %2119 = vmatpush3.bf16.msra.mxu0 %v2118_v61  ;;  %2150 = vmatpush3.bf16.msra.mxu1 %v2118_v61  ;;  %v2128_v16 = vpack.c.bf16 %v497_v52, %v492_v50 }
  0xef   :  { %2121 = vmatprep.subr.bf16.mxu0 %v2120_v62  ;;  %2143 = vmatprep.subr.bf16.mxu1 %v2120_v62 }
  0xf0   :  { %1180 = vmatprep.mubr.f32.mxu0 %v2215_v11  ;;  %1265 = vmatprep.mubr.f32.mxu1 %v3177_v0  ;;  %v502_v0 = vld [vmem:[%s3935_s1 + $0xe80] sm:$0xff] }
  0xf1   :  { %1181 = vmatmul.mubr.f32.gmra.mrb[14].mxu0 %v2216_v12  ;;  %1266 = vmatmul.mubr.f32.gmra.mrb[14].mxu1 %v3183_v2  ;;  %v507_v2 = vld [vmem:[%s3935_s1 + $0xea8] sm:$0xff] }
  0xf2   :  { %2123 = vmatpush3.bf16.msra.mxu0 %v2122_v6  ;;  %2151 = vmatpush3.bf16.msra.mxu1 %v2122_v6  ;;  %v2132_v21 = vpack.c.bf16 %v507_v2, %v502_v0 }
  0xf3   :  { %2125 = vmatprep.subr.bf16.mxu0 %v2124_v7  ;;  %2144 = vmatprep.subr.bf16.mxu1 %v2124_v7 }
  0xf4   :  { %1335 = vmatprep.mubr.f32.mxu0 %v3215_v14  ;;  %1345 = vmatprep.mubr.f32.mxu1 %v3560_v9  ;;  %v512_v14 = vld [vmem:[%s3935_s1 + $0xed0] sm:$0xff]  ;;  %v517_v9 = vld [vmem:[%s3935_s1 + $0xef8] sm:$0xff] }
  0xf5   :  { %v2136_v26 = vpack.c.bf16 %v517_v9, %v512_v14 }
  0xf6   :  { %2127 = vmatpush3.bf16.msra.mxu0 %v2126_v15  ;;  %2152 = vmatpush3.bf16.msra.mxu1 %v2126_v15 }
  0xf7   :  { %2129 = vmatprep.subr.bf16.mxu0 %v2128_v16  ;;  %2145 = vmatprep.subr.bf16.mxu1 %v2128_v16 }
  0xfa   :  { %2131 = vmatpush3.bf16.msra.mxu0 %v2130_v20  ;;  %2153 = vmatpush3.bf16.msra.mxu1 %v2130_v20 }
  0xfb   :  { %2133 = vmatprep.subr.bf16.mxu0 %v2132_v21  ;;  %2146 = vmatprep.subr.bf16.mxu1 %v2132_v21 }
  0xfe   :  { %2135 = vmatpush3.bf16.msra.mxu0 %v2134_v25  ;;  %2154 = vmatpush3.bf16.msra.mxu1 %v2134_v25 }
  0xff   :  { %2137 = vmatprep.subr.bf16.mxu0 %v2136_v26  ;;  %2147 = vmatprep.subr.bf16.mxu1 %v2136_v26 }
 0x102   :  { %2139 = vmatpush3.bf16.msra.mxu0 %v2138_v29  ;;  %2155 = vmatpush3.bf16.msra.mxu1 %v2138_v29 }
 0x105   :  { %1336 = vmatmul.mubr.f32.vlgmr.msra.gmra.mrb[16].mxu0 %v3505_v48  ;;  %1346 = vmatmul.mubr.f32.vlgmr.msra.gmra.mrb[16].mxu1 %v3572_v13  ;;  %v1490_v48 = vrot.slane %v3857_v33, %v1489_v32  ;;  %v532_v13 = vsub.s32 4, %v3851_v31 }
 0x106   :  { %1340 = vmatprep.mubr.f32.mxu0 %v3522_v57  ;;  %1350 = vmatprep.mubr.f32.mxu1 %v3584_v19  ;;  %v528_v19 = vsub.s32 2, %v3851_v31 }
 0x107   :  { %v1493_v57 = vsel %vm1492_vm0, %v1490_v48, -inf  ;;  %v533_v37 = vrot.slane %v3857_v33, %v532_v13 }
 0x108   :  { %1494 = vmax.xlane.f32.xlu0 %v1493_v57  ;;  %v529_v39 = vrot.slane %v3857_v33, %v528_v19 }
 0x109   :  { %1341 = vmatmul.mubr.f32.gmra.mrb[18].mxu0 %v3541_v1  ;;  %1351 = vmatmul.mubr.f32.gmra.mrb[18].mxu1 %v3623_v34  ;;  %v3862_v1 = vsub.s32 0, %v3851_v31  ;;  %v536_v34 = vsub.s32 6, %v3851_v31 }
 0x10b   :  { %v525_v35 = vrot.slane %v3857_v33, %v3862_v1  ;;  %v537_v40 = vrot.slane %v3857_v33, %v536_v34  ;;  %v558_v43 = vrot.slane %v533_v37, %v3862_v1  ;;  %v3875_v44 = vrot.slane %v529_v39, %v3862_v1 }
 0x10d   :  { %v550_v41 = vrot.slane %v525_v35, %v3862_v1  ;;  %v3878_v47 = vrot.slane %v537_v40, %v3862_v1 }
 0x198   :  { %v811_v42 = vpop.f32.mrb[0].mxu0  ;;  %v1078_v45 = vpop.f32.mrb[0].mxu1 }
 0x199   :  { %v813_v46 = vpop.f32.mrb[1].mxu0  ;;  %v1080_v51 = vpop.f32.mrb[1].mxu1  ;;  %v2156_v53 = vadd.f32 %v811_v42, %v550_v41  ;;  %v2164_v54 = vadd.f32 %v1078_v45, %v558_v43 }
 0x19a   :  { %v2157_v55 = vadd.f32 %v813_v46, %v3875_v44  ;;  %v2165_v58 = vadd.f32 %v1080_v51, %v3878_v47 }
 0x19b   :  { %v1356_v3 = vmax.f32 %v2156_v53, 0.0  ;;  %v1358_v4 = vmax.f32 %v2164_v54, 0.0 }
 0x19c   :  { %v817_v56 = vpop.f32.mrb[2].mxu0  ;;  %v1084_v59 = vpop.f32.mrb[2].mxu1  ;;  %v1357_v5 = vmax.f32 %v2157_v55, 0.0  ;;  %v1359_v10 = vmax.f32 %v2165_v58, 0.0 }
 0x19d   :  { %v2158_v23 = vadd.f32 %v817_v56, %v550_v41  ;;  %v819_v60 = vpop.f32.mrb[3].mxu0  ;;  %v2166_v61 = vadd.f32 %v1084_v59, %v558_v43  ;;  %v1086_v63 = vpop.f32.mrb[3].mxu1 }
 0x19e   :  { %v2159_v62 = vadd.f32 %v819_v60, %v3875_v44  ;;  %v2167_v38 = vadd.f32 %v1086_v63, %v3878_v47 }
 0x19f   :  { %v1361_v36 = vmax.f32 %v2158_v23, 0.0  ;;  %v1363_v6 = vmax.f32 %v2166_v61, 0.0 }
 0x1a0   :  { %v1362_v7 = vmax.f32 %v2159_v62, 0.0  ;;  %v823_v8 = vpop.f32.mrb[4].mxu0  ;;  %v1364_v52 = vmax.f32 %v2167_v38, 0.0  ;;  %v1090_v12 = vpop.f32.mrb[4].mxu1 }
 0x1a1   :  { %v1382_v50 = vsel %vm1380_vm1, %v1361_v36, 0.0  ;;  %v2160_v11 = vadd.f32 %v823_v8, %v550_v41  ;;  %v825_v15 = vpop.f32.mrb[5].mxu0  ;;  %v1424_v17 = vsel %vm1422_vm2, %v1363_v6, 0.0  ;;  %v2168_v0 = vadd.f32 %v1090_v12, %v558_v43  ;;  %v1092_v2 = vpop.f32.mrb[5].mxu1 }
 0x1a2   :  { %v1385_v16 = vmax.f32 %v1356_v3, %v1382_v50  ;;  %v1402_v18 = vsel %vm1400_vm3, %v1362_v7, 0.0  ;;  %v1427_v20 = vmax.f32 %v1358_v4, %v1424_v17  ;;  %v1446_v22 = vsel %vm1444_vm4, %v1364_v52, 0.0 }
 0x1a3   :  { %v1405_v21 = vmax.f32 %v1357_v5, %v1402_v18  ;;  %v1449_v14 = vmax.f32 %v1359_v10, %v1446_v22  ;;  %v1366_v9 = vmax.f32 %v2160_v11, 0.0  ;;  %v2161_v25 = vadd.f32 %v825_v15, %v3875_v44 }
 0x1a4   :  { %v1386_v24 = vrot.slane %v1385_v16, 4  ;;  %v829_v26 = vpop.f32.mrb[6].mxu0  ;;  %v1428_v27 = vrot.slane %v1427_v20, 4  ;;  %v1368_v29 = vmax.f32 %v2168_v0, 0.0  ;;  %v1096_v32 = vpop.f32.mrb[6].mxu1  ;;  %v2169_v19 = vadd.f32 %v1092_v2, %v3878_v47 }
 0x1a5   :  { %v1406_v28 = vrot.slane %v1405_v21, 4  ;;  %v2162_v30 = vadd.f32 %v829_v26, %v550_v41  ;;  %v831_v48 = vpop.f32.mrb[7].mxu0  ;;  %v1450_v13 = vrot.slane %v1449_v14, 4  ;;  %v2170_v34 = vadd.f32 %v1096_v32, %v558_v43  ;;  %v1098_v35 = vpop.f32.mrb[7].mxu1  ;;  %v519_v0 = vld [vmem:[%s3937_s2 + $0x8] sm:$0x3] }
 0x1a6   :  { %v1387_v57 = vmax.f32 %v1385_v16, %v1386_v24  ;;  %v1429_v37 = vmax.f32 %v1427_v20, %v1428_v27  ;;  %v1367_v40 = vmax.f32 %v2161_v25, 0.0  ;;  %v2163_v53 = vadd.f32 %v831_v48, %v3875_v44 }
 0x1a7   :  { %v1407_v39 = vmax.f32 %v1405_v21, %v1406_v28  ;;  %v1371_v42 = vmax.f32 %v2162_v30, 0.0  ;;  %v1451_v46 = vmax.f32 %v1449_v14, %v1450_v13  ;;  %v1373_v51 = vmax.f32 %v2170_v34, 0.0 }
 0x1a8   :  { %v1388_v45 = vrot.slane %v1387_v57, 2  ;;  %v1430_v54 = vrot.slane %v1429_v37, 2  ;;  %v2171_v56 = vadd.f32 %v1098_v35, %v3878_v47  ;;  %v1372_v63 = vmax.f32 %v2163_v53, 0.0 }
 0x1a9   :  { %v1408_v55 = vrot.slane %v1407_v39, 2  ;;  %v1384_v41 = vsel %vm1380_vm1, %v1371_v42, 0.0  ;;  %v1452_v23 = vrot.slane %v1451_v46, 2  ;;  %v1426_v59 = vsel %vm1422_vm2, %v1373_v51, 0.0 }
 0x1aa   :  { %v1389_v58 = vmax.f32 %v1387_v57, %v1388_v45  ;;  %v1392_v43 = vmax.f32 %v1366_v9, %v1384_v41  ;;  %v1431_v60 = vmax.f32 %v1429_v37, %v1430_v54  ;;  %v1434_v62 = vmax.f32 %v1368_v29, %v1426_v59 }
 0x1ab   :  { %v1409_v61 = vmax.f32 %v1407_v39, %v1408_v55  ;;  %v1453_v36 = vmax.f32 %v1451_v46, %v1452_v23  ;;  %v1374_v38 = vmax.f32 %v2171_v56, 0.0  ;;  %v1404_v47 = vsel %vm1400_vm3, %v1372_v63, 0.0 }
 0x1ac   :  { %v1390_v3 = vrot.slane %v1389_v58, 1  ;;  %v1393_v44 = vrot.slane %v1392_v43, 4  ;;  %v1432_v4 = vrot.slane %v1431_v60, 1  ;;  %v1435_v6 = vrot.slane %v1434_v62, 4 }
 0x1ad   :  { %v1410_v5 = vrot.slane %v1409_v61, 1  ;;  %v1369_v8 = vmax.f32 %v2169_v19, 0.0  ;;  %v1412_v50 = vmax.f32 %v1367_v40, %v1404_v47  ;;  %v1454_v11 = vrot.slane %v1453_v36, 1 }
 0x1ae   :  { %v1391_v7 = vmax.f32 %v1389_v58, %v1390_v3  ;;  %v1394_v10 = vmax.f32 %v1392_v43, %v1393_v44  ;;  %v1436_v12 = vmax.f32 %v1434_v62, %v1435_v6  ;;  %v1448_v15 = vsel %vm1444_vm4, %v1374_v38, 0.0 }
 0x1af   :  { %v1411_v52 = vmax.f32 %v1409_v61, %v1410_v5  ;;  %v1413_v17 = vrot.slane %v1412_v50, 4  ;;  %v1456_v18 = vmax.f32 %v1369_v8, %v1448_v15  ;;  %v1433_v2 = vmax.f32 %v1431_v60, %v1432_v4 }
 0x1b0   :  { %v1395_v16 = vrot.slane %v1394_v10, 2  ;;  %v1437_v21 = vrot.slane %v1436_v12, 2  ;;  %v3914_v9 = vmax.f32 %v1453_v36, %v1454_v11  ;;  %v541_v25 = vrot.slane %v519_v0, %v3862_v1 }
 0x1b1   :  { %v1419_v20 = vmax.f32 %v1391_v7, %v1411_v52  ;;  %v1414_v24 = vmax.f32 %v1412_v50, %v1413_v17  ;;  %v1457_v14 = vrot.slane %v1456_v18, 4 }
 0x1b2   :  { %v1396_v22 = vmax.f32 %v1394_v10, %v1395_v16  ;;  %v1438_v28 = vmax.f32 %v1436_v12, %v1437_v21  ;;  %v566_v13 = vrot.slane %v541_v25, %v3862_v1 }
 0x1b3   :  { %v3917_v26 = vmax.f32 %v1419_v20, %v1433_v2  ;;  %v1415_v29 = vrot.slane %v1414_v24, 2  ;;  %v1458_v30 = vmax.f32 %v1456_v18, %v1457_v14 }
 0x1b4   :  { %v1397_v27 = vrot.slane %v1396_v22, 1  ;;  %v1439_v34 = vrot.slane %v1438_v28, 1 }
 0x1b5   :  { %v1463_v32 = vmax.f32 %v3917_v26, %v3914_v9  ;;  %v1416_v48 = vmax.f32 %v1414_v24, %v1415_v29  ;;  %v1459_v57 = vrot.slane %v1458_v30, 2 }
 0x1b6   :  { %v1398_v19 = vmax.f32 %v1396_v22, %v1397_v27  ;;  %v1440_v55 = vmax.f32 %v1438_v28, %v1439_v34 }
 0x1b7   :  { %v1417_v35 = vrot.slane %v1416_v48, 1  ;;  %v1460_v37 = vmax.f32 %v1458_v30, %v1459_v57 }
 0x1b8   :  { %v1560_v39 = vpop.f32.mrb[8].mxu0  ;;  %v1604_v40 = vpop.f32.mrb[8].mxu1 }
 0x1b9   :  { %v1561_v42 = vpop.f32.mrb[9].mxu0  ;;  %v1418_v45 = vmax.f32 %v1416_v48, %v1417_v35  ;;  %v1461_v46 = vrot.slane %v1460_v37, 1  ;;  %v1605_v53 = vpop.f32.mrb[9].mxu1 }
 0x1ba   :  { %v1562_v51 = vadd.f32 %v1561_v42, %v1560_v39  ;;  %v1606_v54 = vadd.f32 %v1605_v53, %v1604_v40 }
 0x1bb   :  { %v1420_v41 = vmax.f32 %v1398_v19, %v1418_v45  ;;  %v3922_v59 = vmax.f32 %v1460_v37, %v1461_v46 }
 0x1bc   :  { %v1168_v56 = vadd.f32 %v1562_v51, %v566_v13  ;;  %v1563_v58 = vpop.f32.mrb[10].mxu0  ;;  %v1607_v43 = vpop.f32.mrb[10].mxu1 }
 0x1bd   :  { %v1564_v23 = vpop.f32.mrb[11].mxu0  ;;  %v1608_v61 = vpop.f32.mrb[11].mxu1  ;;  %v1442_v62 = vmax.f32 %v1420_v41, %v1440_v55 }
 0x1be   :  { %v1253_v1 = vadd.f32 %v1606_v54, %v1168_v56  ;;  %v1565_v60 = vadd.f32 %v1564_v23, %v1563_v58  ;;  %v1609_v63 = vadd.f32 %v1608_v61, %v1607_v43  ;;  %v1498_v43 = vsub.s32 1, %v3851_v31  ;;  %v1495_v31 = vpop.xlane.xlu0 %1494 }
 0x1bf   :  { %v1464_v44 = vmax.f32 %v1442_v62, %v3922_v59 }
 0x1c0   :  { %v1173_v3 = vadd.f32 %v1565_v60, %v566_v13  ;;  %v1566_v36 = vpop.f32.mrb[12].mxu0  ;;  %v1610_v4 = vpop.f32.mrb[12].mxu1  ;;  %v1499_v61 = vrot.slane %v3857_v33, %v1498_v43 }
 0x1c1   :  { %v1567_v38 = vpop.f32.mrb[13].mxu0  ;;  %v1611_v47 = vpop.f32.mrb[13].mxu1 }
 0x1c2   :  { %v1258_v5 = vadd.f32 %v1609_v63, %v1173_v3  ;;  %v1568_v6 = vadd.f32 %v1567_v38, %v1566_v36  ;;  %v1612_v7 = vadd.f32 %v1611_v47, %v1610_v4 }
 0x1c4   :  { %v1178_v8 = vadd.f32 %v1568_v6, %v566_v13  ;;  %v1569_v10 = vpop.f32.mrb[14].mxu0  ;;  %v1613_v52 = vpop.f32.mrb[14].mxu1  ;;  %v1514_v6 = vrot.slane %v1495_v31, %v1498_v43 }
 0x1c5   :  { %v1570_v50 = vpop.f32.mrb[15].mxu0  ;;  %v1614_v15 = vpop.f32.mrb[15].mxu1 }
 0x1c6   :  { %v1263_v11 = vadd.f32 %v1612_v7, %v1178_v8  ;;  %v1571_v12 = vadd.f32 %v1570_v50, %v1569_v10  ;;  %v1615_v16 = vadd.f32 %v1614_v15, %v1613_v52 }
 0x1c8   :  { %v1183_v17 = vadd.f32 %v1571_v12, %v566_v13 }
 0x1ca   :  { %v1268_v18 = vadd.f32 %v1615_v16, %v1183_v17 }
 0x1d8   :  { %v1648_v0 = vpop.f32.mrb[16].mxu0  ;;  %v1654_v2 = vpop.f32.mrb[16].mxu1 }
 0x1d9   :  { %v1649_v20 = vpop.f32.mrb[17].mxu0  ;;  %v1655_v22 = vpop.f32.mrb[17].mxu1 }
 0x1da   :  { %v1650_v21 = vadd.f32 %v1649_v20, %v1648_v0  ;;  %v1656_v24 = vadd.f32 %v1655_v22, %v1654_v2 }
 0x1dc   :  { %v1338_v14 = vadd.f32 %v1650_v21, %v1253_v1  ;;  %v1651_v25 = vpop.f32.mrb[18].mxu0  ;;  %v1348_v27 = vadd.f32 %v1656_v24, %v1263_v11  ;;  %v1657_v28 = vpop.f32.mrb[18].mxu1 }
 0x1dd   :  { %v1652_v29 = vpop.f32.mrb[19].mxu0  ;;  %v1658_v48 = vpop.f32.mrb[19].mxu1 }
 0x1de   :  { %v1653_v30 = vadd.f32 %v1652_v29, %v1651_v25  ;;  %v1659_v57 = vadd.f32 %v1658_v48, %v1657_v28  ;;  %v1360_v35 = vmax.f32 %v1338_v14, 0.0  ;;  %v1370_v39 = vmax.f32 %v1348_v27, 0.0 }
 0x1e0   :  { %v1343_v19 = vadd.f32 %v1653_v30, %v1258_v5  ;;  %v1353_v34 = vadd.f32 %v1659_v57, %v1268_v18 }
 0x1e2   :  { %v1365_v13 = vmax.f32 %v1343_v19, 0.0  ;;  %v1375_v37 = vmax.f32 %v1353_v34, 0.0 }
 0x1e4   :  { %v1468_v40 = vsel %vm1466_vm5, %v1365_v13, 0.0  ;;  %v1470_v45 = vsel %vm1466_vm5, %v1375_v37, 0.0 }
 0x1e5   :  { %v1471_v42 = vmax.f32 %v1360_v35, %v1468_v40  ;;  %v1478_v46 = vmax.f32 %v1370_v39, %v1470_v45 }
 0x1e7   :  { %v1472_v51 = vrot.slane %v1471_v42, 4  ;;  %v1479_v53 = vrot.slane %v1478_v46, 4 }
 0x1e9   :  { %v1473_v54 = vmax.f32 %v1471_v42, %v1472_v51  ;;  %v1480_v55 = vmax.f32 %v1478_v46, %v1479_v53 }
 0x1eb   :  { %v1474_v41 = vrot.slane %v1473_v54, 2  ;;  %v1481_v56 = vrot.slane %v1480_v55, 2 }
 0x1ed   :  { %v1475_v58 = vmax.f32 %v1473_v54, %v1474_v41  ;;  %v1482_v23 = vmax.f32 %v1480_v55, %v1481_v56 }
 0x1ef   :  { %v1476_v49 = vrot.slane %v1475_v58, 1  ;;  %v1483_v59 = vrot.slane %v1482_v23, 1 }
 0x1f1   :  { %v1477_v1 = vmax.f32 %v1475_v58, %v1476_v49  ;;  %v1484_v60 = vmax.f32 %v1482_v23, %v1483_v59 }
 0x1f3   :  { %v1485_v62 = vmax.f32 %v1463_v32, %v1477_v1  ;;  %v1486_v63 = vmax.f32 %v1464_v44, %v1484_v60 }
 0x1f5   :  { %v1501_v3 = vmul.f32 %v1499_v61, %v1486_v63  ;;  %v1500_v36 = vmul.f32 %v1499_v61, %v1485_v62 }
 0x1f7   :  { %v1504_v38 = vrot.slane %v1501_v3, 7 }
 0x1f9   :  { %v1505_v4 = vsel %vm1492_vm0, %v1504_v38, %v1500_v36 }
 0x1fa   :  { %v1508_v5 = vsel %vm1507_vm6, %v1505_v4, 0.0 }
 0x1fb   :  { %1509 = vadd.xlane.f32.xlu0 %v1508_v5 }
 0x288   :  { %v1510_v47 = vpop.xlane.xlu0 %1509 }
 0x289   :  { %v1515_v7 = vadd.f32 %v1514_v6, %v1510_v47 }
 0x28b   :  { %v1516_v8 = vsub.f32 0.0, %v1515_v7 }
 0x28d   :  { %v1517_v10 = vmul.f32 1.442695, %v1516_v8 }
 0x28f   :  { %2204 = vpow2.f32 %v1517_v10 }
 0x299   :  { %v2205_v33 = vpop.eup %2204 }
 0x29a   :  { %v1519_v50 = vadd.f32 1.0, %v2205_v33 }
 0x29c   :  { %2206 = vrcp.f32 %v1519_v50 }
 0x2a6   :  { %v2207_v9 = vpop.eup %2206 }
 0x2a7   :  { %1523 = vst.msk [vmem:[%s3938_s3] sm:$0x3] %vm1522_vm7, %v2207_v9 }

</bundles_post_ra>
